<compile_context>
chip_gen: v6e
topology: v6e:2x2x1
jax: 0.10.0
libtpu: 0.0.40
codegen_flags: <defaults>
</compile_context>

<pallas_src>
import jax
import jax.numpy as jnp
from jax import lax
from jax.experimental import pallas as pl
from jax.experimental.pallas import tpu as pltpu


# ---------------------------------------------------------------------------
# Kernels
# ---------------------------------------------------------------------------

def _emb_head_kernel_folded(x_ref, w_ref, b_ref, o_ref):
    # x: (TB, K=C*HW) bf16   w: (K, E) bf16, already scaled by 1/HW   b: (1, E) f32
    x = x_ref[...]
    if x.dtype != jnp.bfloat16:
        x = x.astype(jnp.bfloat16)          # no-op when the producer emits bf16
    # Pool + projection in ONE MXU matmul (f32 accumulation); no XLU reduce.
    y = jnp.dot(x, w_ref[...], preferred_element_type=jnp.float32)
    y = y + b_ref[...]
    # F.normalize: 1/max(||y||, 1e-12) == rsqrt(max(||y||^2, 1e-24)) up to rounding.
    inv = lax.rsqrt(jnp.maximum(jnp.sum(y * y, axis=-1, keepdims=True), 1e-24))
    o_ref[...] = (y * inv).astype(o_ref.dtype)


def _emb_head_kernel_pooled(x_ref, w_ref, b_ref, o_ref):
    # Fallback when the expanded (C*HW, E) weight would not fit VMEM comfortably.
    # x: (TB, C, HW)   w: (C, E) bf16   b: (1, E) f32
    hw = x_ref.shape[-1]
    # Upcast fused into the reduction: per-vreg cast, no full-tile f32 temporary.
    feats = jnp.sum(x_ref[...], axis=-1, dtype=jnp.float32) * (1.0 / hw)
    y = jnp.dot(feats.astype(jnp.bfloat16), w_ref[...],
                preferred_element_type=jnp.float32)
    y = y + b_ref[...]
    inv = lax.rsqrt(jnp.maximum(jnp.sum(y * y, axis=-1, keepdims=True), 1e-24))
    o_ref[...] = (y * inv).astype(o_ref.dtype)


# ---------------------------------------------------------------------------
# Generation-aware sizing helpers
# ---------------------------------------------------------------------------

def _round_up(n, m):
    return ((n + m - 1) // m) * m


def _vmem_budget_bytes():
    """~75% of this chip's per-TensorCore VMEM (v5e/v6e: 128 MiB, v7x: 64 MiB)."""
    cap = None
    try:
        cap = pltpu.get_tpu_info().vmem_capacity_bytes
    except Exception:
        cap = None
    if not cap:
        cap = 64 * 2**20          # conservative fallback (v7x per-core VMEM)
    return int(cap * 0.75)


def _choose_tile_b(B, per_row_bytes, resident_bytes, vmem_budget):
    """Biggest batch tile that fits (double-buffered), >=2 steps for v7x's 2 TCs."""
    avail = max(vmem_budget - resident_bytes, 4 * 2**20)
    max_tile = max(8, (avail // (2 * per_row_bytes)) // 8 * 8)
    if B <= 8:
        return B                   # tiny batch: single whole-batch step
    # At least 2 grid steps so dimension_semantics=("parallel",) can shard the
    # batch across both v7x TensorCores; cap at 512 rows/step (amortizes the
    # ~0.35 us per-step overhead while bounding the x tile).
    tile = min(512, max_tile, _round_up(pl.cdiv(B, 2), 8))
    return max(tile, 8)


# ---------------------------------------------------------------------------
# pallas_call wrappers
# ---------------------------------------------------------------------------

def _run_folded(x2, w2, b2, out_dtype, vmem_budget):
    B, K = x2.shape
    E = w2.shape[1]
    x_itemsize = jnp.dtype(x2.dtype).itemsize
    o_itemsize = jnp.dtype(out_dtype).itemsize

    resident = 2 * (K * E * 2 + E * 4)                 # bf16 weight + f32 bias
    per_row = K * x_itemsize + E * o_itemsize          # x row + out row
    tile_b = _choose_tile_b(B, per_row, resident, vmem_budget)
    grid = (pl.cdiv(B, tile_b),)

    cost = pl.CostEstimate(
        flops=int(2 * B * K * E + 4 * B * E),
        transcendentals=int(B),
        bytes_accessed=int(B * K * x_itemsize + K * E * 2 + E * 4
                           + B * E * o_itemsize),
    )

    return pl.pallas_call(
        _emb_head_kernel_folded,
        out_shape=jax.ShapeDtypeStruct((B, E), out_dtype),
        grid_spec=pltpu.PrefetchScalarGridSpec(
            num_scalar_prefetch=0,
            grid=grid,
            in_specs=[
                pl.BlockSpec((tile_b, K), lambda i: (i, 0)),
                pl.BlockSpec((K, E), lambda i: (0, 0)),
                pl.BlockSpec((1, E), lambda i: (0, 0)),
            ],
            out_specs=pl.BlockSpec((tile_b, E), lambda i: (i, 0)),
        ),
        compiler_params=pltpu.CompilerParams(
            dimension_semantics=("parallel",),
            vmem_limit_bytes=int(vmem_budget),
        ),
        cost_estimate=cost,
    )(x2, w2, b2)


def _run_pooled(x3, w_bf16, b2, out_dtype, vmem_budget):
    B, C, HW = x3.shape
    E = w_bf16.shape[1]
    x_itemsize = jnp.dtype(x3.dtype).itemsize
    o_itemsize = jnp.dtype(out_dtype).itemsize

    resident = 2 * (C * E * 2 + E * 4)
    per_row = C * HW * x_itemsize + E * o_itemsize
    tile_b = _choose_tile_b(B, per_row, resident, vmem_budget)
    grid = (pl.cdiv(B, tile_b),)

    cost = pl.CostEstimate(
        flops=int(B * C * HW + 2 * B * C * E + 4 * B * E),
        transcendentals=int(B),
        bytes_accessed=int(B * C * HW * x_itemsize + C * E * 2 + E * 4
                           + B * E * o_itemsize),
    )

    return pl.pallas_call(
        _emb_head_kernel_pooled,
        out_shape=jax.ShapeDtypeStruct((B, E), out_dtype),
        grid_spec=pltpu.PrefetchScalarGridSpec(
            num_scalar_prefetch=0,
            grid=grid,
            in_specs=[
                pl.BlockSpec((tile_b, C, HW), lambda i: (i, 0, 0)),
                pl.BlockSpec((C, E), lambda i: (0, 0)),
                pl.BlockSpec((1, E), lambda i: (0, 0)),
            ],
            out_specs=pl.BlockSpec((tile_b, E), lambda i: (i, 0)),
        ),
        compiler_params=pltpu.CompilerParams(
            dimension_semantics=("parallel",),
            vmem_limit_bytes=int(vmem_budget),
        ),
        cost_estimate=cost,
    )(x3, w_bf16, b2)


def embedding_head_forward(x, w, b, *, out_dtype=jnp.float32, force_pooled=False):
    """EmbeddingHead forward.

    x: (B, C, H, W) activations in the producer's dtype (ideally bf16, no cast
       is added here), w: (out_dim=C, emb_dim) f32 (pre-transposed vs torch),
       b: (1, emb_dim) or (emb_dim,) f32.  Returns (B, emb_dim) in out_dtype
       (pass jnp.bfloat16 if downstream accepts it, halving writeback traffic).
    """
    B, C, H, W = x.shape
    HW = H * W
    E = w.shape[1]
    b2 = jnp.asarray(b, jnp.float32).reshape(1, E)
    vmem_budget = _vmem_budget_bytes()

    # Fold the global-average-pool into the projection weight when the expanded
    # (C*HW, E) bf16 weight stays a small, resident fraction of VMEM; otherwise
    # fall back to the in-kernel pool + small matmul.
    folded_w_bytes = C * HW * E * 2
    use_folded = (not force_pooled) and (folded_w_bytes <= vmem_budget // 4)

    if use_folded:
        # One-time weight prep (would be cached alongside the weights in practice).
        w2 = (jnp.repeat(w, HW, axis=0) * (1.0 / HW)).astype(jnp.bfloat16)
        x2 = x.reshape(B, C * HW)          # free row-major reshape, dtype untouched
        return _run_folded(x2, w2, b2, out_dtype, vmem_budget)

    w_bf16 = w.astype(jnp.bfloat16)
    x3 = x.reshape(B, C, HW)               # free reshape, dtype untouched
    return _run_pooled(x3, w_bf16, b2, out_dtype, vmem_budget)


# ---------------------------------------------------------------------------
# References
# ---------------------------------------------------------------------------

def _reference_forward_f32(x, w, b):
    feats = jnp.mean(x.astype(jnp.float32), axis=(2, 3))
    y = jnp.dot(feats, w, precision=lax.Precision.HIGHEST) + b
    norm = jnp.sqrt(jnp.sum(y * y, axis=-1, keepdims=True))
    return y / jnp.maximum(norm, 1e-12)


def _reference_forward_folded(x, w, b):
    # Precision-matched to the folded kernel: bf16 operands, pool baked into W2.
    B, C, H, W = x.shape
    HW = H * W
    w2 = (jnp.repeat(w, HW, axis=0) * (1.0 / HW)).astype(jnp.bfloat16)
    y = jnp.dot(x.reshape(B, C * HW).astype(jnp.bfloat16), w2,
                preferred_element_type=jnp.float32) + b
    norm = jnp.sqrt(jnp.sum(y * y, axis=-1, keepdims=True))
    return y / jnp.maximum(norm, 1e-12)


# ---------------------------------------------------------------------------
# Demo / self-test
# ---------------------------------------------------------------------------

if __name__ == "__main__":
    # Small, module-consistent shapes: extractor.out_dim = C = 32, emb_dim = 128.
    B, C, H, W = 8, 32, 16, 16
    out_dim, emb_dim = C, 128

    key = jax.random.PRNGKey(0)
    kx, kw, kb = jax.random.split(key, 3)

    # The upstream extractor is modelled as emitting bf16 activations directly
    # (halves x HBM traffic for this HBM-bound kernel); no wrapper-side cast.
    x = jax.random.normal(kx, (B, C, H, W), dtype=jnp.float32).astype(jnp.bfloat16)

    # Deterministic nn.Linear-style init: U(-1/sqrt(in), 1/sqrt(in)).
    # torch stores weight as (emb_dim, out_dim); we keep it pre-transposed.
    bound = 1.0 / (out_dim ** 0.5)
    w = jax.random.uniform(kw, (out_dim, emb_dim), jnp.float32, -bound, bound)
    b = jax.random.uniform(kb, (1, emb_dim), jnp.float32, -bound, bound)

    emb_folded = jax.block_until_ready(embedding_head_forward(x, w, b))
    emb_pooled = jax.block_until_ready(
        embedding_head_forward(x, w, b, force_pooled=True))

    ref_f32 = _reference_forward_f32(x, w, b)
    ref_folded = _reference_forward_folded(x, w, b)

    assert emb_folded.shape == (B, emb_dim)
    assert emb_pooled.shape == (B, emb_dim)
    # Tight check against the precision-matched (folded, bf16-operand) reference.
    assert jnp.allclose(emb_folded, ref_folded, atol=2e-3, rtol=2e-3)
    # Sanity checks against the full-f32 reference (bf16 operand tolerance).
    assert jnp.allclose(emb_folded, ref_f32, atol=3e-2, rtol=3e-2)
    assert jnp.allclose(emb_pooled, ref_f32, atol=3e-2, rtol=3e-2)
    # Rows are unit-norm.
    assert jnp.allclose(jnp.linalg.norm(emb_folded, axis=1), 1.0, atol=1e-3)
    assert jnp.allclose(jnp.linalg.norm(emb_pooled, axis=1), 1.0, atol=1e-3)

    print("KERNEL_OK")
</pallas_src>

<mosaic_0001>
module attributes {stable_mosaic.version = 11 : i64} {
  func.func @_emb_head_kernel_folded(%arg0: i32, %arg1: memref<8x8192xbf16, #tpu.memory_space<vmem>>, %arg2: memref<8192x128xbf16, #tpu.memory_space<vmem>>, %arg3: memref<1x128xf32, #tpu.memory_space<vmem>>, %arg4: memref<8x128xf32, #tpu.memory_space<vmem>>) attributes {dimension_semantics = [#tpu.dimension_semantics<parallel>], iteration_bounds = array<i64: 1>, scalar_prefetch = 0 : i64, scratch_operands = 0 : i64, tpu.core_type = #tpu.core_type<tc>, window_params = [{transform_indices = @transform_0, window_bounds = array<i64: 8, 8192>}, {pipeline_mode = #tpu.pipeline_mode<synchronous>, transform_indices = @transform_1, window_bounds = array<i64: 8192, 128>}, {pipeline_mode = #tpu.pipeline_mode<synchronous>, transform_indices = @transform_2, window_bounds = array<i64: 1, 128>}, {transform_indices = @transform_3, window_bounds = array<i64: 8, 128>}]} {
    %c0 = arith.constant 0 : index
    %c0_0 = arith.constant 0 : index
    %0 = vector.load %arg1[%c0, %c0_0] : memref<8x8192xbf16, #tpu.memory_space<vmem>>, vector<8x8192xbf16>
    %c0_1 = arith.constant 0 : index
    %c0_2 = arith.constant 0 : index
    %1 = vector.load %arg2[%c0_1, %c0_2] : memref<8192x128xbf16, #tpu.memory_space<vmem>>, vector<8192x128xbf16>
    %cst = arith.constant dense<0.000000e+00> : vector<8x128xf32>
    %2 = tpu.matmul %0, %1, %cst {dimension_numbers = #tpu.dot_dimension_numbers<[1], [0], [0], [1], [0, 0, 1, 1], [], []>} : vector<8x8192xbf16>, vector<8192x128xbf16>, vector<8x128xf32> -> vector<8x128xf32>
    %c0_3 = arith.constant 0 : index
    %c0_4 = arith.constant 0 : index
    %3 = vector.load %arg3[%c0_3, %c0_4] : memref<1x128xf32, #tpu.memory_space<vmem>>, vector<1x128xf32>
    %4 = vector.broadcast %3 : vector<1x128xf32> to vector<8x128xf32>
    %5 = arith.addf %2, %4 : vector<8x128xf32>
    %6 = arith.mulf %5, %5 : vector<8x128xf32>
    %cst_5 = arith.constant dense<0.000000e+00> : vector<8xf32>
    %7 = vector.multi_reduction <add>, %6, %cst_5 [1] : vector<8x128xf32> to vector<8xf32>
    %8 = vector.shape_cast %7 : vector<8xf32> to vector<8x1xf32>
    %cst_6 = arith.constant 1.000000e-24 : f32
    %9 = vector.broadcast %cst_6 : f32 to vector<8x1xf32>
    %10 = arith.maximumf %8, %9 : vector<8x1xf32>
    %11 = math.rsqrt %10 : vector<8x1xf32>
    %12 = vector.broadcast %11 : vector<8x1xf32> to vector<8x128xf32>
    %13 = arith.mulf %5, %12 : vector<8x128xf32>
    %c0_7 = arith.constant 0 : index
    %c0_8 = arith.constant 0 : index
    %14 = vector.load %arg4[%c0_7, %c0_8] : memref<8x128xf32, #tpu.memory_space<vmem>>, vector<8x128xf32>
    tpu.vector_store %arg4[%c0_7, %c0_8], %13 {strides = array<i32>} : memref<8x128xf32, #tpu.memory_space<vmem>>, vector<8x128xf32>,
    return
  }
  func.func @transform_0(%arg0: i32) -> (i32, i32) {
    %c0_i32 = arith.constant 0 : i32
    %c0_i32_0 = arith.constant 0 : i32
    return %arg0, %c0_i32 : i32, i32
  }
  func.func @transform_1(%arg0: i32) -> (i32, i32) {
    %c0_i32 = arith.constant 0 : i32
    %c0_i32_0 = arith.constant 0 : i32
    %c0_i32_1 = arith.constant 0 : i32
    return %c0_i32, %c0_i32_0 : i32, i32
  }
  func.func @transform_2(%arg0: i32) -> (i32, i32) {
    %c0_i32 = arith.constant 0 : i32
    %c0_i32_0 = arith.constant 0 : i32
    %c0_i32_1 = arith.constant 0 : i32
    return %c0_i32, %c0_i32_0 : i32, i32
  }
  func.func @transform_3(%arg0: i32) -> (i32, i32) {
    %c0_i32 = arith.constant 0 : i32
    %c0_i32_0 = arith.constant 0 : i32
    return %arg0, %c0_i32 : i32, i32
  }
}

</mosaic_0001>

<bundles_post_ra>
// kernel: tpu_custom_call.1
= control target key start
LH: loop header
LB: loop body
LE: loop exit
PB: predicated region body
PF: predicated region fallthrough
CT: control target
= control target key end

     0   :  { %8 = vsyncpa [#allocation3], 0  ;;  %s7731_s0 = inlined_call_operand.hbm [shape: bf16[8,8192], index: 0, kind: input, shape index: {}]   ;;  %s7732_s1 = inlined_call_operand.hbm [shape: bf16[8192,128], index: 1, kind: input, shape index: {}]   ;;  %s7733_s2 = inlined_call_operand.hbm [shape: f32[1,128], index: 2, kind: input, shape index: {}]   ;;  %s7734_s3 = inlined_call_operand.hbm [shape: f32[8,128], index: 3, kind: output, shape index: {}]  }
   0x1   :  { %9 = vsyncpa [#allocation6], 0 }
   0x2   :  { %10 = vsyncpa [#allocation4], 0  ;;  %s7666_s12 = smov [#allocation5]  }
   0x3   :  { %s26_s13 = sshll.u32 %s7666_s12, 4  ;;  %s27_s13 = int_to_ptr.vmem [resolvable:$true] %s26_s13 }
   0x4   :  { %s7588_s14 = scalar_lea.vmem %s27_s13, 65536  ;;  %p7593_p1 = scmp.lt.s32.totalorder %s27_s13, %s27_s13 }
   0x5   :  { %p7589_p0 = scmp.ne.s32.totalorder %s27_s13, %s7588_s14  ;;  %p7594_p2 = scmp.lt.s32.totalorder %s7588_s14, %s7588_s14 }
   0x7   :  { %p7595_p3 = por %p7594_p2, %p7593_p1 }
   0x9   :  { %p7596_p4 = pnand %p7595_p3, %p7589_p0 }
   0xb   :  { %7599 = shalt.err (!%p7596_p4)
}
   0xc   :  { %s7667_s15 = smov 64   ;;  %s7668_s16 = smov 4  }
   0xd   :  { %32 = dma.hbm_to_vmem [thread:$0]  %s7732_s1, 65536, %s27_s13, [#allocation6], %s7667_s15, %s7667_s15, %s7668_s16  }
   0xe   :  { %s7669_s19 = smov [#allocation2]   ;;  %s7670_s21 = smov [#allocation7]  }
   0xf   :  { %s17_s20 = sshll.u32 %s7669_s19, 4  ;;  %s39_s22 = sshll.u32 %s7670_s21, 4  ;;  %s18_s20 = int_to_ptr.vmem [resolvable:$true] %s17_s20  ;;  %s40_s22 = int_to_ptr.vmem [resolvable:$true] %s39_s22 }
  0x10   :  { %s7608_s23 = scalar_lea.vmem %s18_s20, 4096  ;;  %p7613_p6 = scmp.lt.s32.totalorder %s18_s20, %s18_s20 }
  0x11   :  { %p7609_p5 = scmp.ne.s32.totalorder %s18_s20, %s7608_s23  ;;  %p7614_p7 = scmp.lt.s32.totalorder %s7608_s23, %s7608_s23 }
  0x13   :  { %p7615_p8 = por %p7614_p7, %p7613_p6 }
  0x15   :  { %p7616_p9 = pnand %p7615_p8, %p7609_p5 }
  0x17   :  { %7619 = shalt.err (!%p7616_p9)
}
  0x18   :  { %20 = dma.hbm_to_vmem [thread:$0]  %s7731_s0, 4096, %s18_s20, [#allocation3]  }
  0x19   :  { %s7628_s26 = scalar_lea.vmem %s40_s22, 16  ;;  %s7632_s1 = scalar_lea.vmem %s40_s22, 32 }
  0x1a   :  { %p7629_p10 = scmp.ne.s32.totalorder %s40_s22, %s7628_s26  ;;  %p7633_p11 = scmp.lt.s32.totalorder %s40_s22, %s40_s22 }
  0x1b   :  { %p7634_p12 = scmp.lt.s32.totalorder %s7632_s1, %s7628_s26 }
  0x1d   :  { %p7635_p13 = por %p7634_p12, %p7633_p11 }
  0x1f   :  { %p7636_p0 = pnand %p7635_p13, %p7629_p10 }
  0x21   :  { %7639 = shalt.err (!%p7636_p0)
}
  0x22   :  { %42 = dma.hbm_to_vmem [thread:$0]  %s7733_s2, 16, %s40_s22, [#allocation6]  }
  0x23   :  { %7660 = dma.done.wait [#allocation3], 4096  }
  0x24   :  { %7661 = vsyncadd [#allocation3], 4294963200 }
  0x25   :  { %7662 = dma.done.wait [#allocation6], 65552  }
  0x26   :  { %7663 = vsyncadd [#allocation6], 4294901744  ;;  %v7002_v0 = vld [vmem:[#allocation5 + $0x78] sm:$0xff]   ;;  %v7006_v4 = vld [vmem:[#allocation5 + $0x70] sm:$0xff]   ;;  %s7671_s0 = smov [#allocation8]  }
  0x27   :  { %v7003_v1 = vld [vmem:[#allocation5 + $0xf8] sm:$0xff]   ;;  %6292 = vmatprep.subr.bf16.mxu0 %v7002_v0  ;;  %v7007_v5 = vld [vmem:[#allocation5 + $0xf0] sm:$0xff]   ;;  %v7010_v8 = vld [vmem:[#allocation5 + $0x68] sm:$0xff]   ;;  %s5705_s2 = sshll.u32 %s7671_s0, 4  ;;  %s5706_s2 = int_to_ptr.vmem [resolvable:$true] %s5705_s2 }
  0x28   :  { %v7004_v2 = vld [vmem:[#allocation5 + $0x38] sm:$0xff]   ;;  %6314 = vmatprep.subr.bf16.mxu1 %v7003_v1  ;;  %v7008_v6 = vld [vmem:[#allocation5 + $0x30] sm:$0xff]   ;;  %v7011_v9 = vld [vmem:[#allocation5 + $0xe8] sm:$0xff]   ;;  %s7640_s29 = scalar_lea.vmem %s5706_s2, 128  ;;  %p7645_p2 = scmp.lt.s32.totalorder %s5706_s2, %s5706_s2 }
  0x29   :  { %v7005_v3 = vld [vmem:[#allocation5 + $0xb8] sm:$0xff]   ;;  %6293 = vmatpush3.bf16.msra.mxu0 %v7004_v2  ;;  %v7009_v7 = vld [vmem:[#allocation5 + $0xb0] sm:$0xff]   ;;  %v7012_v10 = vld [vmem:[#allocation5 + $0x28] sm:$0xff]   ;;  %p7641_p1 = scmp.ne.s32.totalorder %s5706_s2, %s7640_s29  ;;  %p7646_p3 = scmp.lt.s32.totalorder %s7640_s29, %s7640_s29 }
  0x2a   :  { %6315 = vmatpush3.bf16.msra.mxu1 %v7005_v3  ;;  %6294 = vmatprep.subr.bf16.mxu0 %v7006_v4  ;;  %v7013_v11 = vld [vmem:[#allocation5 + $0xa8] sm:$0xff]   ;;  %v7014_v12 = vld [vmem:[#allocation5 + $0x60] sm:$0xff]   ;;  %v7018_v16 = vld [vmem:[#allocation5 + $0x58] sm:$0xff]  }
  0x2b   :  { %6316 = vmatprep.subr.bf16.mxu1 %v7007_v5  ;;  %v7015_v13 = vld [vmem:[#allocation5 + $0xe0] sm:$0xff]   ;;  %v7019_v17 = vld [vmem:[#allocation5 + $0xd8] sm:$0xff]   ;;  %v7022_v20 = vld [vmem:[#allocation5 + $0x50] sm:$0xff]   ;;  %p7647_p4 = por %p7646_p3, %p7645_p2 }
  0x2c   :  { %v7016_v14 = vld [vmem:[#allocation5 + $0x20] sm:$0xff]   ;;  %v7020_v18 = vld [vmem:[#allocation5 + $0x18] sm:$0xff]   ;;  %v7023_v21 = vld [vmem:[#allocation5 + $0xd0] sm:$0xff]  }
  0x2d   :  { %6295 = vmatpush3.bf16.msra.mxu0 %v7008_v6  ;;  %v7017_v15 = vld [vmem:[#allocation5 + $0xa0] sm:$0xff]   ;;  %v7021_v19 = vld [vmem:[#allocation5 + $0x98] sm:$0xff]   ;;  %v7024_v22 = vld [vmem:[#allocation5 + $0x10] sm:$0xff]   ;;  %p7648_p5 = pnand %p7647_p4, %p7641_p1 }
  0x2e   :  { %6317 = vmatpush3.bf16.msra.mxu1 %v7009_v7  ;;  %6296 = vmatprep.subr.bf16.mxu0 %v7010_v8  ;;  %v7025_v23 = vld [vmem:[#allocation5 + $0x90] sm:$0xff]   ;;  %v7026_v24 = vld [vmem:[#allocation5 + $0x48] sm:$0xff]   ;;  %v7030_v28 = vld [vmem:[#allocation5 + $0x40] sm:$0xff]  }
  0x2f   :  { %6318 = vmatprep.subr.bf16.mxu1 %v7011_v9  ;;  %v7027_v25 = vld [vmem:[#allocation5 + $0xc8] sm:$0xff]   ;;  %v7031_v29 = vld [vmem:[#allocation5 + $0xc0] sm:$0xff]   ;;  %v7038_v38 = vld [vmem:[#allocation5 + $0x178] sm:$0xff]  }
  0x30   :  { %v7028_v26 = vld [vmem:[#allocation5 + $0x8] sm:$0xff]   ;;  %v7032_v30 = vld [vmem:[#allocation5] sm:$0xff]   ;;  %v7039_v39 = vld [vmem:[#allocation5 + $0x1f8] sm:$0xff]  }
  0x31   :  { %6297 = vmatpush3.bf16.msra.mxu0 %v7012_v10  ;;  %v7029_v27 = vld [vmem:[#allocation5 + $0x88] sm:$0xff]   ;;  %v7033_v31 = vld [vmem:[#allocation5 + $0x80] sm:$0xff]   ;;  %v7040_v40 = vld [vmem:[#allocation5 + $0x138] sm:$0xff]  }
  0x32   :  { %6319 = vmatpush3.bf16.msra.mxu1 %v7013_v11  ;;  %6298 = vmatprep.subr.bf16.mxu0 %v7014_v12  ;;  %v53_v32 = vld [vmem:[#allocation2] sm:$0xff]  ;;  %v54_v33 = vld [vmem:[#allocation2 + $0x8] sm:$0xff]  ;;  %v7041_v41 = vld [vmem:[#allocation5 + $0x1b8] sm:$0xff]  }
  0x33   :  { %6320 = vmatprep.subr.bf16.mxu1 %v7015_v13  ;;  %v5716_v34 = vcombine.low %v53_v32, %v53_v32  ;;  %v5717_v35 = vcombine.high %v53_v32, %v53_v32  ;;  %v5718_v36 = vcombine.low %v54_v33, %v54_v33  ;;  %v5719_v37 = vcombine.high %v54_v33, %v54_v33  ;;  %v7042_v42 = vld [vmem:[#allocation5 + $0x170] sm:$0xff]   ;;  %v7046_v46 = vld [vmem:[#allocation5 + $0x168] sm:$0xff]   ;;  %v7050_v50 = vld [vmem:[#allocation5 + $0x160] sm:$0xff]  }
  0x34   :  { %v7043_v43 = vld [vmem:[#allocation5 + $0x1f0] sm:$0xff]   ;;  %v7047_v47 = vld [vmem:[#allocation5 + $0x1e8] sm:$0xff]   ;;  %v7051_v51 = vld [vmem:[#allocation5 + $0x1e0] sm:$0xff]  }
  0x35   :  { %6299 = vmatpush3.bf16.msra.mxu0 %v7016_v14  ;;  %4444 = vmatprep.mubr.bf16.mxu0 %v5717_v35  ;;  %v7044_v44 = vld [vmem:[#allocation5 + $0x130] sm:$0xff]   ;;  %v7048_v48 = vld [vmem:[#allocation5 + $0x128] sm:$0xff]   ;;  %v7052_v52 = vld [vmem:[#allocation5 + $0x120] sm:$0xff]  }
  0x36   :  { %6321 = vmatpush3.bf16.msra.mxu1 %v7017_v15  ;;  %6300 = vmatprep.subr.bf16.mxu0 %v7018_v16  ;;  %v7045_v45 = vld [vmem:[#allocation5 + $0x1b0] sm:$0xff]   ;;  %v7049_v49 = vld [vmem:[#allocation5 + $0x1a8] sm:$0xff]   ;;  %v7053_v53 = vld [vmem:[#allocation5 + $0x1a0] sm:$0xff]  }
  0x37   :  { %6322 = vmatprep.subr.bf16.mxu1 %v7019_v17  ;;  %4484 = vmatprep.mubr.bf16.mxu1 %v5719_v37  ;;  %v7054_v54 = vld [vmem:[#allocation5 + $0x158] sm:$0xff]   ;;  %v7058_v58 = vld [vmem:[#allocation5 + $0x150] sm:$0xff]   ;;  %v7062_v62 = vld [vmem:[#allocation5 + $0x148] sm:$0xff]  }
  0x38   :  { %v7055_v55 = vld [vmem:[#allocation5 + $0x1d8] sm:$0xff]   ;;  %v7059_v59 = vld [vmem:[#allocation5 + $0x1d0] sm:$0xff]   ;;  %v7063_v63 = vld [vmem:[#allocation5 + $0x1c8] sm:$0xff]  }
  0x39   :  { %6301 = vmatpush3.bf16.msra.mxu0 %v7020_v18  ;;  %v7056_v56 = vld [vmem:[#allocation5 + $0x118] sm:$0xff]   ;;  %v7060_v60 = vld [vmem:[#allocation5 + $0x110] sm:$0xff]   ;;  %v7064_v0 = vld [vmem:[#allocation5 + $0x108] sm:$0xff]  }
  0x3a   :  { %6323 = vmatpush3.bf16.msra.mxu1 %v7021_v19  ;;  %6302 = vmatprep.subr.bf16.mxu0 %v7022_v20  ;;  %v7057_v57 = vld [vmem:[#allocation5 + $0x198] sm:$0xff]   ;;  %v7061_v61 = vld [vmem:[#allocation5 + $0x190] sm:$0xff]   ;;  %v7065_v1 = vld [vmem:[#allocation5 + $0x188] sm:$0xff]  }
  0x3b   :  { %6324 = vmatprep.subr.bf16.mxu1 %v7023_v21  ;;  %v7066_v2 = vld [vmem:[#allocation5 + $0x140] sm:$0xff]   ;;  %v55_v6 = vld [vmem:[#allocation2 + $0x10] sm:$0xff]  ;;  %v56_v9 = vld [vmem:[#allocation2 + $0x18] sm:$0xff] }
  0x3c   :  { %v7067_v3 = vld [vmem:[#allocation5 + $0x1c0] sm:$0xff]   ;;  %v5720_v7 = vcombine.low %v55_v6, %v55_v6  ;;  %v5721_v8 = vcombine.high %v55_v6, %v55_v6  ;;  %v5722_v10 = vcombine.low %v56_v9, %v56_v9  ;;  %v5723_v11 = vcombine.high %v56_v9, %v56_v9  ;;  %v7074_v12 = vld [vmem:[#allocation5 + $0x278] sm:$0xff]   ;;  %v7078_v16 = vld [vmem:[#allocation5 + $0x270] sm:$0xff]  }
  0x3d   :  { %6303 = vmatpush3.bf16.msra.mxu0 %v7024_v22  ;;  %v7068_v4 = vld [vmem:[#allocation5 + $0x100] sm:$0xff]   ;;  %v7075_v13 = vld [vmem:[#allocation5 + $0x2f8] sm:$0xff]   ;;  %v7079_v17 = vld [vmem:[#allocation5 + $0x2f0] sm:$0xff]  }
  0x3e   :  { %6325 = vmatpush3.bf16.msra.mxu1 %v7025_v23  ;;  %6304 = vmatprep.subr.bf16.mxu0 %v7026_v24  ;;  %v7069_v5 = vld [vmem:[#allocation5 + $0x180] sm:$0xff]   ;;  %v7076_v14 = vld [vmem:[#allocation5 + $0x238] sm:$0xff]   ;;  %v7080_v18 = vld [vmem:[#allocation5 + $0x230] sm:$0xff]  }
  0x3f   :  { %6326 = vmatprep.subr.bf16.mxu1 %v7027_v25  ;;  %v7077_v15 = vld [vmem:[#allocation5 + $0x2b8] sm:$0xff]   ;;  %v7081_v19 = vld [vmem:[#allocation5 + $0x2b0] sm:$0xff]   ;;  %v7082_v20 = vld [vmem:[#allocation5 + $0x268] sm:$0xff]  }
  0x40   :  { %v7083_v21 = vld [vmem:[#allocation5 + $0x2e8] sm:$0xff]   ;;  %v7086_v24 = vld [vmem:[#allocation5 + $0x260] sm:$0xff]   ;;  %v7094_v32 = vld [vmem:[#allocation5 + $0x250] sm:$0xff]  }
  0x41   :  { %6305 = vmatpush3.bf16.msra.mxu0 %v7028_v26  ;;  %v7084_v22 = vld [vmem:[#allocation5 + $0x228] sm:$0xff]   ;;  %v7087_v25 = vld [vmem:[#allocation5 + $0x2e0] sm:$0xff]   ;;  %v7095_v33 = vld [vmem:[#allocation5 + $0x2d0] sm:$0xff]  }
  0x42   :  { %6327 = vmatpush3.bf16.msra.mxu1 %v7029_v27  ;;  %6306 = vmatprep.subr.bf16.mxu0 %v7030_v28  ;;  %v7085_v23 = vld [vmem:[#allocation5 + $0x2a8] sm:$0xff]   ;;  %v7088_v26 = vld [vmem:[#allocation5 + $0x220] sm:$0xff]   ;;  %v7090_v28 = vld [vmem:[#allocation5 + $0x258] sm:$0xff]  }
  0x43   :  { %6328 = vmatprep.subr.bf16.mxu1 %v7031_v29  ;;  %v7089_v27 = vld [vmem:[#allocation5 + $0x2a0] sm:$0xff]   ;;  %v7091_v29 = vld [vmem:[#allocation5 + $0x2d8] sm:$0xff]   ;;  %v7097_v35 = vld [vmem:[#allocation5 + $0x290] sm:$0xff]  }
  0x44   :  { %v7099_v37 = vld [vmem:[#allocation5 + $0x2c8] sm:$0xff]   ;;  %v7130_v6 = vld [vmem:[#allocation5 + $0x350] sm:$0xff]  }
  0x45   :  { %6307 = vmatpush3.bf16.msra.mxu0 %v7032_v30  ;;  %v7092_v30 = vld [vmem:[#allocation5 + $0x218] sm:$0xff]   ;;  %v7133_v9 = vld [vmem:[#allocation5 + $0x390] sm:$0xff]  }
  0x46   :  { %6329 = vmatpush3.bf16.msra.mxu1 %v7033_v31  ;;  %6336 = vmatprep.subr.bf16.mxu0 %v7038_v38  ;;  %v7093_v31 = vld [vmem:[#allocation5 + $0x298] sm:$0xff]   ;;  %v7100_v38 = vld [vmem:[#allocation5 + $0x208] sm:$0xff]  }
  0x47   :  { %6358 = vmatprep.subr.bf16.mxu1 %v7039_v39  ;;  %v7101_v39 = vld [vmem:[#allocation5 + $0x288] sm:$0xff]  }
  0x48   :  { %4445 = vmatmul.mubr.bf16.vlgmr.msra.gmra.mxu0 %v5716_v34  ;;  %v7096_v34 = vld [vmem:[#allocation5 + $0x210] sm:$0xff]  }
  0x49   :  { %4485 = vmatmul.mubr.bf16.vlgmr.msra.gmra.mxu1 %v5718_v36  ;;  %6337 = vmatpush3.bf16.msra.mxu0 %v7040_v40  ;;  %v7098_v36 = vld [vmem:[#allocation5 + $0x248] sm:$0xff]   ;;  %v7102_v40 = vld [vmem:[#allocation5 + $0x240] sm:$0xff]  }
  0x4a   :  { %6359 = vmatpush3.bf16.msra.mxu1 %v7041_v41  ;;  %6338 = vmatprep.subr.bf16.mxu0 %v7042_v42  ;;  %v7103_v41 = vld [vmem:[#allocation5 + $0x2c0] sm:$0xff]  }
  0x4b   :  { %6360 = vmatprep.subr.bf16.mxu1 %v7043_v43  ;;  %4524 = vmatprep.mubr.bf16.mxu0 %v5721_v8  ;;  %v7104_v42 = vld [vmem:[#allocation5 + $0x200] sm:$0xff]   ;;  %v7132_v8 = vld [vmem:[#allocation5 + $0x310] sm:$0xff]  }
  0x4c   :  { %4564 = vmatprep.mubr.bf16.mxu1 %v5723_v11  ;;  %v7105_v43 = vld [vmem:[#allocation5 + $0x280] sm:$0xff]   ;;  %v7135_v11 = vld [vmem:[#allocation5 + $0x3c8] sm:$0xff]  }
  0x4d   :  { %6339 = vmatpush3.bf16.msra.mxu0 %v7044_v44  ;;  %v57_v44 = vld [vmem:[#allocation2 + $0x20] sm:$0xff] }
  0x4e   :  { %6361 = vmatpush3.bf16.msra.mxu1 %v7045_v45  ;;  %6340 = vmatprep.subr.bf16.mxu0 %v7046_v46  ;;  %v58_v45 = vld [vmem:[#allocation2 + $0x28] sm:$0xff]  ;;  %v5724_v46 = vcombine.low %v57_v44, %v57_v44 }
  0x4f   :  { %6362 = vmatprep.subr.bf16.mxu1 %v7047_v47  ;;  %v5725_v47 = vcombine.high %v57_v44, %v57_v44  ;;  %v7166_v44 = vld [vmem:[#allocation5 + $0x450] sm:$0xff]  }
  0x51   :  { %6341 = vmatpush3.bf16.msra.mxu0 %v7048_v48  ;;  %v5726_v48 = vcombine.low %v58_v45, %v58_v45 }
  0x52   :  { %6363 = vmatpush3.bf16.msra.mxu1 %v7049_v49  ;;  %6342 = vmatprep.subr.bf16.mxu0 %v7050_v50  ;;  %v5727_v49 = vcombine.high %v58_v45, %v58_v45  ;;  %v7110_v50 = vld [vmem:[#allocation5 + $0x378] sm:$0xff]   ;;  %v7167_v45 = vld [vmem:[#allocation5 + $0x4d0] sm:$0xff]  }
  0x53   :  { %6364 = vmatprep.subr.bf16.mxu1 %v7051_v51  ;;  %v7111_v51 = vld [vmem:[#allocation5 + $0x3f8] sm:$0xff]  }
  0x55   :  { %6343 = vmatpush3.bf16.msra.mxu0 %v7052_v52  ;;  %v7112_v52 = vld [vmem:[#allocation5 + $0x338] sm:$0xff]  }
  0x56   :  { %6365 = vmatpush3.bf16.msra.mxu1 %v7053_v53  ;;  %6344 = vmatprep.subr.bf16.mxu0 %v7054_v54  ;;  %v7113_v53 = vld [vmem:[#allocation5 + $0x3b8] sm:$0xff]   ;;  %v7114_v54 = vld [vmem:[#allocation5 + $0x370] sm:$0xff]  }
  0x57   :  { %6366 = vmatprep.subr.bf16.mxu1 %v7055_v55  ;;  %v7115_v55 = vld [vmem:[#allocation5 + $0x3f0] sm:$0xff]  }
  0x59   :  { %6345 = vmatpush3.bf16.msra.mxu0 %v7056_v56  ;;  %v7116_v56 = vld [vmem:[#allocation5 + $0x330] sm:$0xff]  }
  0x5a   :  { %6367 = vmatpush3.bf16.msra.mxu1 %v7057_v57  ;;  %6346 = vmatprep.subr.bf16.mxu0 %v7058_v58  ;;  %v7117_v57 = vld [vmem:[#allocation5 + $0x3b0] sm:$0xff]   ;;  %v7118_v58 = vld [vmem:[#allocation5 + $0x368] sm:$0xff]  }
  0x5b   :  { %6368 = vmatprep.subr.bf16.mxu1 %v7059_v59  ;;  %v7119_v59 = vld [vmem:[#allocation5 + $0x3e8] sm:$0xff]  }
  0x5d   :  { %6347 = vmatpush3.bf16.msra.mxu0 %v7060_v60  ;;  %v7120_v60 = vld [vmem:[#allocation5 + $0x328] sm:$0xff]  }
  0x5e   :  { %6369 = vmatpush3.bf16.msra.mxu1 %v7061_v61  ;;  %6348 = vmatprep.subr.bf16.mxu0 %v7062_v62  ;;  %v7121_v61 = vld [vmem:[#allocation5 + $0x3a8] sm:$0xff]   ;;  %v7122_v62 = vld [vmem:[#allocation5 + $0x360] sm:$0xff]  }
  0x5f   :  { %6370 = vmatprep.subr.bf16.mxu1 %v7063_v63  ;;  %v7123_v63 = vld [vmem:[#allocation5 + $0x3e0] sm:$0xff]  }
  0x61   :  { %6349 = vmatpush3.bf16.msra.mxu0 %v7064_v0  ;;  %v7124_v0 = vld [vmem:[#allocation5 + $0x320] sm:$0xff]  }
  0x62   :  { %6371 = vmatpush3.bf16.msra.mxu1 %v7065_v1  ;;  %6350 = vmatprep.subr.bf16.mxu0 %v7066_v2  ;;  %v7125_v1 = vld [vmem:[#allocation5 + $0x3a0] sm:$0xff]   ;;  %v7126_v2 = vld [vmem:[#allocation5 + $0x358] sm:$0xff]  }
  0x63   :  { %6372 = vmatprep.subr.bf16.mxu1 %v7067_v3  ;;  %v7127_v3 = vld [vmem:[#allocation5 + $0x3d8] sm:$0xff]  }
  0x65   :  { %6351 = vmatpush3.bf16.msra.mxu0 %v7068_v4  ;;  %v7128_v4 = vld [vmem:[#allocation5 + $0x318] sm:$0xff]  }
  0x66   :  { %6373 = vmatpush3.bf16.msra.mxu1 %v7069_v5  ;;  %6380 = vmatprep.subr.bf16.mxu0 %v7074_v12  ;;  %v7129_v5 = vld [vmem:[#allocation5 + $0x398] sm:$0xff]   ;;  %v7136_v12 = vld [vmem:[#allocation5 + $0x308] sm:$0xff]  }
  0x67   :  { %6402 = vmatprep.subr.bf16.mxu1 %v7075_v13  ;;  %v7137_v13 = vld [vmem:[#allocation5 + $0x388] sm:$0xff]  }
  0x68   :  { %4525 = vmatmul.mubr.bf16.vlgmr.msra.gmra.mxu0 %v5720_v7  ;;  %v7131_v7 = vld [vmem:[#allocation5 + $0x3d0] sm:$0xff]  }
  0x69   :  { %4565 = vmatmul.mubr.bf16.vlgmr.msra.gmra.mxu1 %v5722_v10  ;;  %6381 = vmatpush3.bf16.msra.mxu0 %v7076_v14  ;;  %v7134_v10 = vld [vmem:[#allocation5 + $0x348] sm:$0xff]   ;;  %v7138_v14 = vld [vmem:[#allocation5 + $0x340] sm:$0xff]  }
  0x6a   :  { %6403 = vmatpush3.bf16.msra.mxu1 %v7077_v15  ;;  %6382 = vmatprep.subr.bf16.mxu0 %v7078_v16  ;;  %v7139_v15 = vld [vmem:[#allocation5 + $0x3c0] sm:$0xff]  }
  0x6b   :  { %6404 = vmatprep.subr.bf16.mxu1 %v7079_v17  ;;  %4604 = vmatprep.mubr.bf16.mxu0 %v5725_v47  ;;  %v7140_v16 = vld [vmem:[#allocation5 + $0x300] sm:$0xff]   ;;  %v7169_v47 = vld [vmem:[#allocation5 + $0x490] sm:$0xff]  }
  0x6c   :  { %4644 = vmatprep.mubr.bf16.mxu1 %v5727_v49  ;;  %v7141_v17 = vld [vmem:[#allocation5 + $0x380] sm:$0xff]   ;;  %v7171_v49 = vld [vmem:[#allocation5 + $0x4c8] sm:$0xff]  }
  0x6d   :  { %6383 = vmatpush3.bf16.msra.mxu0 %v7080_v18  ;;  %v59_v18 = vld [vmem:[#allocation2 + $0x30] sm:$0xff] }
  0x6e   :  { %6405 = vmatpush3.bf16.msra.mxu1 %v7081_v19  ;;  %6384 = vmatprep.subr.bf16.mxu0 %v7082_v20  ;;  %v60_v19 = vld [vmem:[#allocation2 + $0x38] sm:$0xff]  ;;  %v5728_v20 = vcombine.low %v59_v18, %v59_v18 }
  0x6f   :  { %6406 = vmatprep.subr.bf16.mxu1 %v7083_v21  ;;  %v5729_v21 = vcombine.high %v59_v18, %v59_v18  ;;  %v7202_v18 = vld [vmem:[#allocation5 + $0x550] sm:$0xff]  }
  0x71   :  { %6385 = vmatpush3.bf16.msra.mxu0 %v7084_v22  ;;  %v5730_v22 = vcombine.low %v60_v19, %v60_v19 }
  0x72   :  { %6407 = vmatpush3.bf16.msra.mxu1 %v7085_v23  ;;  %6386 = vmatprep.subr.bf16.mxu0 %v7086_v24  ;;  %v7146_v23 = vld [vmem:[#allocation5 + $0x478] sm:$0xff]   ;;  %v5731_v24 = vcombine.high %v60_v19, %v60_v19  ;;  %v7203_v19 = vld [vmem:[#allocation5 + $0x5d0] sm:$0xff]  }
  0x73   :  { %6408 = vmatprep.subr.bf16.mxu1 %v7087_v25  ;;  %v7147_v25 = vld [vmem:[#allocation5 + $0x4f8] sm:$0xff]  }
  0x75   :  { %6387 = vmatpush3.bf16.msra.mxu0 %v7088_v26  ;;  %v7148_v26 = vld [vmem:[#allocation5 + $0x438] sm:$0xff]  }
  0x76   :  { %6409 = vmatpush3.bf16.msra.mxu1 %v7089_v27  ;;  %6388 = vmatprep.subr.bf16.mxu0 %v7090_v28  ;;  %v7149_v27 = vld [vmem:[#allocation5 + $0x4b8] sm:$0xff]   ;;  %v7150_v28 = vld [vmem:[#allocation5 + $0x470] sm:$0xff]  }
  0x77   :  { %6410 = vmatprep.subr.bf16.mxu1 %v7091_v29  ;;  %v7151_v29 = vld [vmem:[#allocation5 + $0x4f0] sm:$0xff]  }
  0x79   :  { %6389 = vmatpush3.bf16.msra.mxu0 %v7092_v30  ;;  %v7152_v30 = vld [vmem:[#allocation5 + $0x430] sm:$0xff]  }
  0x7a   :  { %6411 = vmatpush3.bf16.msra.mxu1 %v7093_v31  ;;  %6390 = vmatprep.subr.bf16.mxu0 %v7094_v32  ;;  %v7153_v31 = vld [vmem:[#allocation5 + $0x4b0] sm:$0xff]   ;;  %v7154_v32 = vld [vmem:[#allocation5 + $0x468] sm:$0xff]  }
  0x7b   :  { %6412 = vmatprep.subr.bf16.mxu1 %v7095_v33  ;;  %v7155_v33 = vld [vmem:[#allocation5 + $0x4e8] sm:$0xff]  }
  0x7d   :  { %6391 = vmatpush3.bf16.msra.mxu0 %v7096_v34  ;;  %v7156_v34 = vld [vmem:[#allocation5 + $0x428] sm:$0xff]  }
  0x7e   :  { %6413 = vmatpush3.bf16.msra.mxu1 %v7097_v35  ;;  %6392 = vmatprep.subr.bf16.mxu0 %v7098_v36  ;;  %v7157_v35 = vld [vmem:[#allocation5 + $0x4a8] sm:$0xff]   ;;  %v7158_v36 = vld [vmem:[#allocation5 + $0x460] sm:$0xff]  }
  0x7f   :  { %6414 = vmatprep.subr.bf16.mxu1 %v7099_v37  ;;  %v7159_v37 = vld [vmem:[#allocation5 + $0x4e0] sm:$0xff]  }
  0x81   :  { %6393 = vmatpush3.bf16.msra.mxu0 %v7100_v38  ;;  %v7160_v38 = vld [vmem:[#allocation5 + $0x420] sm:$0xff]  }
  0x82   :  { %6415 = vmatpush3.bf16.msra.mxu1 %v7101_v39  ;;  %6394 = vmatprep.subr.bf16.mxu0 %v7102_v40  ;;  %v7161_v39 = vld [vmem:[#allocation5 + $0x4a0] sm:$0xff]   ;;  %v7162_v40 = vld [vmem:[#allocation5 + $0x458] sm:$0xff]  }
  0x83   :  { %6416 = vmatprep.subr.bf16.mxu1 %v7103_v41  ;;  %v7163_v41 = vld [vmem:[#allocation5 + $0x4d8] sm:$0xff]  }
  0x85   :  { %6395 = vmatpush3.bf16.msra.mxu0 %v7104_v42  ;;  %v7164_v42 = vld [vmem:[#allocation5 + $0x418] sm:$0xff]  }
  0x86   :  { %6417 = vmatpush3.bf16.msra.mxu1 %v7105_v43  ;;  %6424 = vmatprep.subr.bf16.mxu0 %v7110_v50  ;;  %v7165_v43 = vld [vmem:[#allocation5 + $0x498] sm:$0xff]   ;;  %v7172_v50 = vld [vmem:[#allocation5 + $0x408] sm:$0xff]  }
  0x87   :  { %6446 = vmatprep.subr.bf16.mxu1 %v7111_v51  ;;  %v7173_v51 = vld [vmem:[#allocation5 + $0x488] sm:$0xff]  }
  0x88   :  { %4605 = vmatmul.mubr.bf16.vlgmr.msra.gmra.mxu0 %v5724_v46  ;;  %v7168_v46 = vld [vmem:[#allocation5 + $0x410] sm:$0xff]  }
  0x89   :  { %4645 = vmatmul.mubr.bf16.vlgmr.msra.gmra.mxu1 %v5726_v48  ;;  %6425 = vmatpush3.bf16.msra.mxu0 %v7112_v52  ;;  %v7170_v48 = vld [vmem:[#allocation5 + $0x448] sm:$0xff]   ;;  %v7174_v52 = vld [vmem:[#allocation5 + $0x440] sm:$0xff]  }
  0x8a   :  { %6447 = vmatpush3.bf16.msra.mxu1 %v7113_v53  ;;  %6426 = vmatprep.subr.bf16.mxu0 %v7114_v54  ;;  %v7175_v53 = vld [vmem:[#allocation5 + $0x4c0] sm:$0xff]  }
  0x8b   :  { %6448 = vmatprep.subr.bf16.mxu1 %v7115_v55  ;;  %4684 = vmatprep.mubr.bf16.mxu0 %v5729_v21  ;;  %v7176_v54 = vld [vmem:[#allocation5 + $0x400] sm:$0xff]   ;;  %v7205_v21 = vld [vmem:[#allocation5 + $0x590] sm:$0xff]  }
  0x8c   :  { %4724 = vmatprep.mubr.bf16.mxu1 %v5731_v24  ;;  %v7177_v55 = vld [vmem:[#allocation5 + $0x480] sm:$0xff]   ;;  %v7208_v24 = vld [vmem:[#allocation5 + $0x508] sm:$0xff]  }
  0x8d   :  { %6427 = vmatpush3.bf16.msra.mxu0 %v7116_v56  ;;  %v61_v56 = vld [vmem:[#allocation2 + $0x40] sm:$0xff] }
  0x8e   :  { %6449 = vmatpush3.bf16.msra.mxu1 %v7117_v57  ;;  %6428 = vmatprep.subr.bf16.mxu0 %v7118_v58  ;;  %v5732_v57 = vcombine.low %v61_v56, %v61_v56  ;;  %v5733_v58 = vcombine.high %v61_v56, %v61_v56  ;;  %v7238_v56 = vld [vmem:[#allocation5 + $0x650] sm:$0xff]  }
  0x8f   :  { %6450 = vmatprep.subr.bf16.mxu1 %v7119_v59  ;;  %v62_v59 = vld [vmem:[#allocation2 + $0x48] sm:$0xff] }
  0x91   :  { %6429 = vmatpush3.bf16.msra.mxu0 %v7120_v60  ;;  %v5734_v60 = vcombine.low %v62_v59, %v62_v59 }
  0x92   :  { %6451 = vmatpush3.bf16.msra.mxu1 %v7121_v61  ;;  %6430 = vmatprep.subr.bf16.mxu0 %v7122_v62  ;;  %v5735_v61 = vcombine.high %v62_v59, %v62_v59  ;;  %v7182_v62 = vld [vmem:[#allocation5 + $0x578] sm:$0xff]   ;;  %v7241_v59 = vld [vmem:[#allocation5 + $0x690] sm:$0xff]  }
  0x93   :  { %6452 = vmatprep.subr.bf16.mxu1 %v7123_v63  ;;  %v7183_v63 = vld [vmem:[#allocation5 + $0x5f8] sm:$0xff]  }
  0x95   :  { %6431 = vmatpush3.bf16.msra.mxu0 %v7124_v0  ;;  %v7184_v0 = vld [vmem:[#allocation5 + $0x538] sm:$0xff]  }
  0x96   :  { %6453 = vmatpush3.bf16.msra.mxu1 %v7125_v1  ;;  %6432 = vmatprep.subr.bf16.mxu0 %v7126_v2  ;;  %v7185_v1 = vld [vmem:[#allocation5 + $0x5b8] sm:$0xff]   ;;  %v7186_v2 = vld [vmem:[#allocation5 + $0x570] sm:$0xff]  }
  0x97   :  { %6454 = vmatprep.subr.bf16.mxu1 %v7127_v3  ;;  %v7187_v3 = vld [vmem:[#allocation5 + $0x5f0] sm:$0xff]  }
  0x99   :  { %6433 = vmatpush3.bf16.msra.mxu0 %v7128_v4  ;;  %v7188_v4 = vld [vmem:[#allocation5 + $0x530] sm:$0xff]  }
  0x9a   :  { %6455 = vmatpush3.bf16.msra.mxu1 %v7129_v5  ;;  %6434 = vmatprep.subr.bf16.mxu0 %v7130_v6  ;;  %v7189_v5 = vld [vmem:[#allocation5 + $0x5b0] sm:$0xff]   ;;  %v7190_v6 = vld [vmem:[#allocation5 + $0x568] sm:$0xff]  }
  0x9b   :  { %6456 = vmatprep.subr.bf16.mxu1 %v7131_v7  ;;  %v7191_v7 = vld [vmem:[#allocation5 + $0x5e8] sm:$0xff]  }
  0x9d   :  { %6435 = vmatpush3.bf16.msra.mxu0 %v7132_v8  ;;  %v7192_v8 = vld [vmem:[#allocation5 + $0x528] sm:$0xff]  }
  0x9e   :  { %6457 = vmatpush3.bf16.msra.mxu1 %v7133_v9  ;;  %6436 = vmatprep.subr.bf16.mxu0 %v7134_v10  ;;  %v7193_v9 = vld [vmem:[#allocation5 + $0x5a8] sm:$0xff]   ;;  %v7194_v10 = vld [vmem:[#allocation5 + $0x560] sm:$0xff]  }
  0x9f   :  { %6458 = vmatprep.subr.bf16.mxu1 %v7135_v11  ;;  %v7195_v11 = vld [vmem:[#allocation5 + $0x5e0] sm:$0xff]  }
  0xa1   :  { %6437 = vmatpush3.bf16.msra.mxu0 %v7136_v12  ;;  %v7196_v12 = vld [vmem:[#allocation5 + $0x520] sm:$0xff]  }
  0xa2   :  { %6459 = vmatpush3.bf16.msra.mxu1 %v7137_v13  ;;  %6438 = vmatprep.subr.bf16.mxu0 %v7138_v14  ;;  %v7197_v13 = vld [vmem:[#allocation5 + $0x5a0] sm:$0xff]   ;;  %v7198_v14 = vld [vmem:[#allocation5 + $0x558] sm:$0xff]  }
  0xa3   :  { %6460 = vmatprep.subr.bf16.mxu1 %v7139_v15  ;;  %v7199_v15 = vld [vmem:[#allocation5 + $0x5d8] sm:$0xff]  }
  0xa5   :  { %6439 = vmatpush3.bf16.msra.mxu0 %v7140_v16  ;;  %v7200_v16 = vld [vmem:[#allocation5 + $0x518] sm:$0xff]  }
  0xa6   :  { %6461 = vmatpush3.bf16.msra.mxu1 %v7141_v17  ;;  %6468 = vmatprep.subr.bf16.mxu0 %v7146_v23  ;;  %v7201_v17 = vld [vmem:[#allocation5 + $0x598] sm:$0xff]   ;;  %v7207_v23 = vld [vmem:[#allocation5 + $0x5c8] sm:$0xff]  }
  0xa7   :  { %6490 = vmatprep.subr.bf16.mxu1 %v7147_v25  ;;  %v7209_v25 = vld [vmem:[#allocation5 + $0x588] sm:$0xff]  }
  0xa8   :  { %4685 = vmatmul.mubr.bf16.vlgmr.msra.gmra.mxu0 %v5728_v20  ;;  %v7204_v20 = vld [vmem:[#allocation5 + $0x510] sm:$0xff]  }
  0xa9   :  { %4725 = vmatmul.mubr.bf16.vlgmr.msra.gmra.mxu1 %v5730_v22  ;;  %6469 = vmatpush3.bf16.msra.mxu0 %v7148_v26  ;;  %v7206_v22 = vld [vmem:[#allocation5 + $0x548] sm:$0xff]   ;;  %v7210_v26 = vld [vmem:[#allocation5 + $0x540] sm:$0xff]  }
  0xaa   :  { %6491 = vmatpush3.bf16.msra.mxu1 %v7149_v27  ;;  %6470 = vmatprep.subr.bf16.mxu0 %v7150_v28  ;;  %v7211_v27 = vld [vmem:[#allocation5 + $0x5c0] sm:$0xff]  }
  0xab   :  { %6492 = vmatprep.subr.bf16.mxu1 %v7151_v29  ;;  %4764 = vmatprep.mubr.bf16.mxu0 %v5733_v58  ;;  %v7212_v28 = vld [vmem:[#allocation5 + $0x500] sm:$0xff]   ;;  %v7240_v58 = vld [vmem:[#allocation5 + $0x610] sm:$0xff]  }
  0xac   :  { %4804 = vmatprep.mubr.bf16.mxu1 %v5735_v61  ;;  %v7213_v29 = vld [vmem:[#allocation5 + $0x580] sm:$0xff]   ;;  %v7243_v61 = vld [vmem:[#allocation5 + $0x6c8] sm:$0xff]  }
  0xad   :  { %6471 = vmatpush3.bf16.msra.mxu0 %v7152_v30  ;;  %v63_v30 = vld [vmem:[#allocation2 + $0x50] sm:$0xff] }
  0xae   :  { %6493 = vmatpush3.bf16.msra.mxu1 %v7153_v31  ;;  %6472 = vmatprep.subr.bf16.mxu0 %v7154_v32  ;;  %v64_v31 = vld [vmem:[#allocation2 + $0x58] sm:$0xff]  ;;  %v5736_v32 = vcombine.low %v63_v30, %v63_v30 }
  0xaf   :  { %6494 = vmatprep.subr.bf16.mxu1 %v7155_v33  ;;  %v5737_v33 = vcombine.high %v63_v30, %v63_v30  ;;  %v7261_v30 = vld [vmem:[#allocation5 + $0x7b0] sm:$0xff]  }
  0xb1   :  { %6473 = vmatpush3.bf16.msra.mxu0 %v7156_v34  ;;  %v5738_v34 = vcombine.low %v64_v31, %v64_v31 }
  0xb2   :  { %6495 = vmatpush3.bf16.msra.mxu1 %v7157_v35  ;;  %6474 = vmatprep.subr.bf16.mxu0 %v7158_v36  ;;  %v5739_v35 = vcombine.high %v64_v31, %v64_v31  ;;  %v7218_v36 = vld [vmem:[#allocation5 + $0x678] sm:$0xff]   ;;  %v7262_v31 = vld [vmem:[#allocation5 + $0x768] sm:$0xff]  }
  0xb3   :  { %6496 = vmatprep.subr.bf16.mxu1 %v7159_v37  ;;  %v7219_v37 = vld [vmem:[#allocation5 + $0x6f8] sm:$0xff]  }
  0xb5   :  { %6475 = vmatpush3.bf16.msra.mxu0 %v7160_v38  ;;  %v7220_v38 = vld [vmem:[#allocation5 + $0x638] sm:$0xff]  }
  0xb6   :  { %6497 = vmatpush3.bf16.msra.mxu1 %v7161_v39  ;;  %6476 = vmatprep.subr.bf16.mxu0 %v7162_v40  ;;  %v7221_v39 = vld [vmem:[#allocation5 + $0x6b8] sm:$0xff]   ;;  %v7222_v40 = vld [vmem:[#allocation5 + $0x670] sm:$0xff]  }
  0xb7   :  { %6498 = vmatprep.subr.bf16.mxu1 %v7163_v41  ;;  %v7223_v41 = vld [vmem:[#allocation5 + $0x6f0] sm:$0xff]  }
  0xb9   :  { %6477 = vmatpush3.bf16.msra.mxu0 %v7164_v42  ;;  %v7224_v42 = vld [vmem:[#allocation5 + $0x630] sm:$0xff]  }
  0xba   :  { %6499 = vmatpush3.bf16.msra.mxu1 %v7165_v43  ;;  %6478 = vmatprep.subr.bf16.mxu0 %v7166_v44  ;;  %v7225_v43 = vld [vmem:[#allocation5 + $0x6b0] sm:$0xff]   ;;  %v7226_v44 = vld [vmem:[#allocation5 + $0x668] sm:$0xff]  }
  0xbb   :  { %6500 = vmatprep.subr.bf16.mxu1 %v7167_v45  ;;  %v7227_v45 = vld [vmem:[#allocation5 + $0x6e8] sm:$0xff]  }
  0xbd   :  { %6479 = vmatpush3.bf16.msra.mxu0 %v7168_v46  ;;  %v7228_v46 = vld [vmem:[#allocation5 + $0x628] sm:$0xff]  }
  0xbe   :  { %6501 = vmatpush3.bf16.msra.mxu1 %v7169_v47  ;;  %6480 = vmatprep.subr.bf16.mxu0 %v7170_v48  ;;  %v7229_v47 = vld [vmem:[#allocation5 + $0x6a8] sm:$0xff]   ;;  %v7230_v48 = vld [vmem:[#allocation5 + $0x660] sm:$0xff]  }
  0xbf   :  { %6502 = vmatprep.subr.bf16.mxu1 %v7171_v49  ;;  %v7231_v49 = vld [vmem:[#allocation5 + $0x6e0] sm:$0xff]  }
  0xc1   :  { %6481 = vmatpush3.bf16.msra.mxu0 %v7172_v50  ;;  %v7232_v50 = vld [vmem:[#allocation5 + $0x620] sm:$0xff]  }
  0xc2   :  { %6503 = vmatpush3.bf16.msra.mxu1 %v7173_v51  ;;  %6482 = vmatprep.subr.bf16.mxu0 %v7174_v52  ;;  %v7233_v51 = vld [vmem:[#allocation5 + $0x6a0] sm:$0xff]   ;;  %v7234_v52 = vld [vmem:[#allocation5 + $0x658] sm:$0xff]  }
  0xc3   :  { %6504 = vmatprep.subr.bf16.mxu1 %v7175_v53  ;;  %v7235_v53 = vld [vmem:[#allocation5 + $0x6d8] sm:$0xff]  }
  0xc5   :  { %6483 = vmatpush3.bf16.msra.mxu0 %v7176_v54  ;;  %v7236_v54 = vld [vmem:[#allocation5 + $0x618] sm:$0xff]  }
  0xc6   :  { %6505 = vmatpush3.bf16.msra.mxu1 %v7177_v55  ;;  %6512 = vmatprep.subr.bf16.mxu0 %v7182_v62  ;;  %v7237_v55 = vld [vmem:[#allocation5 + $0x698] sm:$0xff]   ;;  %v7244_v62 = vld [vmem:[#allocation5 + $0x608] sm:$0xff]  }
  0xc7   :  { %6534 = vmatprep.subr.bf16.mxu1 %v7183_v63  ;;  %v7245_v63 = vld [vmem:[#allocation5 + $0x688] sm:$0xff]  }
  0xc8   :  { %4765 = vmatmul.mubr.bf16.vlgmr.msra.gmra.mxu0 %v5732_v57  ;;  %v7239_v57 = vld [vmem:[#allocation5 + $0x6d0] sm:$0xff]  }
  0xc9   :  { %4805 = vmatmul.mubr.bf16.vlgmr.msra.gmra.mxu1 %v5734_v60  ;;  %6513 = vmatpush3.bf16.msra.mxu0 %v7184_v0  ;;  %v7242_v60 = vld [vmem:[#allocation5 + $0x648] sm:$0xff]   ;;  %v7246_v0 = vld [vmem:[#allocation5 + $0x640] sm:$0xff]  }
  0xca   :  { %6535 = vmatpush3.bf16.msra.mxu1 %v7185_v1  ;;  %6514 = vmatprep.subr.bf16.mxu0 %v7186_v2  ;;  %v7247_v1 = vld [vmem:[#allocation5 + $0x6c0] sm:$0xff]  }
  0xcb   :  { %6536 = vmatprep.subr.bf16.mxu1 %v7187_v3  ;;  %4844 = vmatprep.mubr.bf16.mxu0 %v5737_v33  ;;  %v7248_v2 = vld [vmem:[#allocation5 + $0x600] sm:$0xff]   ;;  %v7264_v33 = vld [vmem:[#allocation5 + $0x728] sm:$0xff]  }
  0xcc   :  { %4884 = vmatprep.mubr.bf16.mxu1 %v5739_v35  ;;  %v7249_v3 = vld [vmem:[#allocation5 + $0x680] sm:$0xff]  }
  0xcd   :  { %6515 = vmatpush3.bf16.msra.mxu0 %v7188_v4  ;;  %v65_v4 = vld [vmem:[#allocation2 + $0x60] sm:$0xff] }
  0xce   :  { %6537 = vmatpush3.bf16.msra.mxu1 %v7189_v5  ;;  %6516 = vmatprep.subr.bf16.mxu0 %v7190_v6  ;;  %v66_v5 = vld [vmem:[#allocation2 + $0x68] sm:$0xff]  ;;  %v7266_v35 = vld [vmem:[#allocation5 + $0x760] sm:$0xff]  }
  0xcf   :  { %6538 = vmatprep.subr.bf16.mxu1 %v7191_v7 }
  0xd1   :  { %6517 = vmatpush3.bf16.msra.mxu0 %v7192_v8  ;;  %v5740_v8 = vcombine.low %v65_v4, %v65_v4 }
  0xd2   :  { %6539 = vmatpush3.bf16.msra.mxu1 %v7193_v9  ;;  %6518 = vmatprep.subr.bf16.mxu0 %v7194_v10  ;;  %v5741_v9 = vcombine.high %v65_v4, %v65_v4  ;;  %v5742_v10 = vcombine.low %v66_v5, %v66_v5 }
  0xd3   :  { %6540 = vmatprep.subr.bf16.mxu1 %v7195_v11  ;;  %v7254_v11 = vld [vmem:[#allocation5 + $0x778] sm:$0xff]  }
  0xd5   :  { %6519 = vmatpush3.bf16.msra.mxu0 %v7196_v12  ;;  %v5743_v12 = vcombine.high %v66_v5, %v66_v5 }
  0xd6   :  { %6541 = vmatpush3.bf16.msra.mxu1 %v7197_v13  ;;  %6520 = vmatprep.subr.bf16.mxu0 %v7198_v14  ;;  %v7255_v13 = vld [vmem:[#allocation5 + $0x7f8] sm:$0xff]  }
  0xd7   :  { %6542 = vmatprep.subr.bf16.mxu1 %v7199_v15 }
  0xd9   :  { %6521 = vmatpush3.bf16.msra.mxu0 %v7200_v16  ;;  %v7256_v16 = vld [vmem:[#allocation5 + $0x738] sm:$0xff]  }
  0xda   :  { %6543 = vmatpush3.bf16.msra.mxu1 %v7201_v17  ;;  %6522 = vmatprep.subr.bf16.mxu0 %v7202_v18 }
  0xdb   :  { %6544 = vmatprep.subr.bf16.mxu1 %v7203_v19  ;;  %v7257_v19 = vld [vmem:[#allocation5 + $0x7b8] sm:$0xff]  }
  0xdd   :  { %6523 = vmatpush3.bf16.msra.mxu0 %v7204_v20  ;;  %v5715_v20 = vld [vmem:[#allocation7] ss:$0 sm:$0xff] }
  0xde   :  { %6545 = vmatpush3.bf16.msra.mxu1 %v7205_v21  ;;  %6524 = vmatprep.subr.bf16.mxu0 %v7206_v22 }
  0xdf   :  { %6546 = vmatprep.subr.bf16.mxu1 %v7207_v23 }
  0xe1   :  { %6525 = vmatpush3.bf16.msra.mxu0 %v7208_v24  ;;  %v7258_v24 = vld [vmem:[#allocation5 + $0x770] sm:$0xff]  }
  0xe2   :  { %6547 = vmatpush3.bf16.msra.mxu1 %v7209_v25  ;;  %6526 = vmatprep.subr.bf16.mxu0 %v7210_v26  ;;  %v7259_v25 = vld [vmem:[#allocation5 + $0x7f0] sm:$0xff]  }
  0xe3   :  { %6548 = vmatprep.subr.bf16.mxu1 %v7211_v27 }
  0xe5   :  { %6527 = vmatpush3.bf16.msra.mxu0 %v7212_v28 }
  0xe6   :  { %6549 = vmatpush3.bf16.msra.mxu1 %v7213_v29  ;;  %6556 = vmatprep.subr.bf16.mxu0 %v7218_v36  ;;  %v7260_v29 = vld [vmem:[#allocation5 + $0x730] sm:$0xff]   ;;  %v7267_v36 = vld [vmem:[#allocation5 + $0x7e0] sm:$0xff]  }
  0xe7   :  { %6578 = vmatprep.subr.bf16.mxu1 %v7219_v37  ;;  %v7268_v37 = vld [vmem:[#allocation5 + $0x720] sm:$0xff]  }
  0xe8   :  { %4845 = vmatmul.mubr.bf16.vlgmr.msra.gmra.mxu0 %v5736_v32  ;;  %v7263_v32 = vld [vmem:[#allocation5 + $0x7e8] sm:$0xff]  }
  0xe9   :  { %4885 = vmatmul.mubr.bf16.vlgmr.msra.gmra.mxu1 %v5738_v34  ;;  %6557 = vmatpush3.bf16.msra.mxu0 %v7220_v38  ;;  %v7265_v34 = vld [vmem:[#allocation5 + $0x7a8] sm:$0xff]   ;;  %v7269_v38 = vld [vmem:[#allocation5 + $0x7a0] sm:$0xff]  }
  0xea   :  { %6579 = vmatpush3.bf16.msra.mxu1 %v7221_v39  ;;  %6558 = vmatprep.subr.bf16.mxu0 %v7222_v40  ;;  %v7270_v39 = vld [vmem:[#allocation5 + $0x758] sm:$0xff]  }
  0xeb   :  { %6580 = vmatprep.subr.bf16.mxu1 %v7223_v41  ;;  %4924 = vmatprep.mubr.bf16.mxu0 %v5741_v9  ;;  %v7271_v40 = vld [vmem:[#allocation5 + $0x7d8] sm:$0xff]  }
  0xec   :  { %4964 = vmatprep.mubr.bf16.mxu1 %v5743_v12  ;;  %v7272_v41 = vld [vmem:[#allocation5 + $0x718] sm:$0xff]  }
  0xed   :  { %6559 = vmatpush3.bf16.msra.mxu0 %v7224_v42  ;;  %v7273_v42 = vld [vmem:[#allocation5 + $0x798] sm:$0xff]  }
  0xee   :  { %6581 = vmatpush3.bf16.msra.mxu1 %v7225_v43  ;;  %6560 = vmatprep.subr.bf16.mxu0 %v7226_v44  ;;  %v7274_v43 = vld [vmem:[#allocation5 + $0x750] sm:$0xff]  }
  0xef   :  { %6582 = vmatprep.subr.bf16.mxu1 %v7227_v45  ;;  %v7275_v44 = vld [vmem:[#allocation5 + $0x7d0] sm:$0xff]  }
  0xf0   :  { %v7276_v45 = vld [vmem:[#allocation5 + $0x710] sm:$0xff]  }
  0xf1   :  { %6561 = vmatpush3.bf16.msra.mxu0 %v7228_v46  ;;  %v7277_v46 = vld [vmem:[#allocation5 + $0x790] sm:$0xff]  }
  0xf2   :  { %6583 = vmatpush3.bf16.msra.mxu1 %v7229_v47  ;;  %6562 = vmatprep.subr.bf16.mxu0 %v7230_v48  ;;  %v7278_v47 = vld [vmem:[#allocation5 + $0x748] sm:$0xff]  }
  0xf3   :  { %6584 = vmatprep.subr.bf16.mxu1 %v7231_v49  ;;  %v7279_v48 = vld [vmem:[#allocation5 + $0x7c8] sm:$0xff]  }
  0xf4   :  { %v7280_v49 = vld [vmem:[#allocation5 + $0x708] sm:$0xff]  }
  0xf5   :  { %6563 = vmatpush3.bf16.msra.mxu0 %v7232_v50  ;;  %v7281_v50 = vld [vmem:[#allocation5 + $0x788] sm:$0xff]  }
  0xf6   :  { %6585 = vmatpush3.bf16.msra.mxu1 %v7233_v51  ;;  %6564 = vmatprep.subr.bf16.mxu0 %v7234_v52  ;;  %v7282_v51 = vld [vmem:[#allocation5 + $0x740] sm:$0xff]  }
  0xf7   :  { %6586 = vmatprep.subr.bf16.mxu1 %v7235_v53  ;;  %v7283_v52 = vld [vmem:[#allocation5 + $0x7c0] sm:$0xff]  }
  0xf8   :  { %v7284_v53 = vld [vmem:[#allocation5 + $0x700] sm:$0xff]  }
  0xf9   :  { %6565 = vmatpush3.bf16.msra.mxu0 %v7236_v54  ;;  %v7285_v54 = vld [vmem:[#allocation5 + $0x780] sm:$0xff]  }
  0xfa   :  { %6587 = vmatpush3.bf16.msra.mxu1 %v7237_v55  ;;  %6566 = vmatprep.subr.bf16.mxu0 %v7238_v56  ;;  %v67_v55 = vld [vmem:[#allocation2 + $0x70] sm:$0xff]  ;;  %v68_v56 = vld [vmem:[#allocation2 + $0x78] sm:$0xff] }
  0xfb   :  { %6588 = vmatprep.subr.bf16.mxu1 %v7239_v57 }
  0xfd   :  { %6567 = vmatpush3.bf16.msra.mxu0 %v7240_v58 }
  0xfe   :  { %6589 = vmatpush3.bf16.msra.mxu1 %v7241_v59  ;;  %6568 = vmatprep.subr.bf16.mxu0 %v7242_v60  ;;  %v5744_v59 = vcombine.low %v67_v55, %v67_v55  ;;  %v5745_v60 = vcombine.high %v67_v55, %v67_v55 }
  0xff   :  { %6590 = vmatprep.subr.bf16.mxu1 %v7243_v61  ;;  %v5746_v61 = vcombine.low %v68_v56, %v68_v56 }
 0x101   :  { %6569 = vmatpush3.bf16.msra.mxu0 %v7244_v62  ;;  %v7290_v62 = vld [vmem:[#allocation5 + $0x878] sm:$0xff]  }
 0x102   :  { %6591 = vmatpush3.bf16.msra.mxu1 %v7245_v63  ;;  %6570 = vmatprep.subr.bf16.mxu0 %v7246_v0  ;;  %v5747_v63 = vcombine.high %v68_v56, %v68_v56  ;;  %v7291_v0 = vld [vmem:[#allocation5 + $0x8f8] sm:$0xff]  }
 0x103   :  { %6592 = vmatprep.subr.bf16.mxu1 %v7247_v1 }
 0x105   :  { %6571 = vmatpush3.bf16.msra.mxu0 %v7248_v2 }
 0x106   :  { %6593 = vmatpush3.bf16.msra.mxu1 %v7249_v3  ;;  %6600 = vmatprep.subr.bf16.mxu0 %v7254_v11  ;;  %v7292_v3 = vld [vmem:[#allocation5 + $0x838] sm:$0xff]   ;;  %v7295_v11 = vld [vmem:[#allocation5 + $0x8f0] sm:$0xff]  }
 0x107   :  { %6622 = vmatprep.subr.bf16.mxu1 %v7255_v13 }
 0x108   :  { %v6308_v6 = vpop.f32.mrf.mxu0  ;;  %4925 = vmatmul.mubr.bf16.vlgmr.msra.gmra.mxu0 %v5740_v8 }
 0x109   :  { %v6330_v7 = vpop.f32.mrf.mxu1  ;;  %4965 = vmatmul.mubr.bf16.vlgmr.msra.gmra.mxu1 %v5742_v10  ;;  %6601 = vmatpush3.bf16.msra.mxu0 %v7256_v16  ;;  %v7294_v10 = vld [vmem:[#allocation5 + $0x870] sm:$0xff]  }
 0x10a   :  { %v6309_v14 = vpop.f32.mrf.mxu0  ;;  %6623 = vmatpush3.bf16.msra.mxu1 %v7257_v19  ;;  %6602 = vmatprep.subr.bf16.mxu0 %v7258_v24  ;;  %v7297_v16 = vld [vmem:[#allocation5 + $0x8b0] sm:$0xff]   ;;  %v7300_v19 = vld [vmem:[#allocation5 + $0x828] sm:$0xff]   ;;  %v7305_v24 = vld [vmem:[#allocation5 + $0x8a0] sm:$0xff]  }
 0x10b   :  { %v6331_v15 = vpop.f32.mrf.mxu1  ;;  %v6310_v17 = vadd.f32 %v6309_v14, %v6308_v6  ;;  %6624 = vmatprep.subr.bf16.mxu1 %v7259_v25  ;;  %5004 = vmatprep.mubr.bf16.mxu0 %v5745_v60  ;;  %v7293_v6 = vld [vmem:[#allocation5 + $0x8b8] sm:$0xff]   ;;  %v7330_v60 = vld [vmem:[#allocation5 + $0x970] sm:$0xff]  }
 0x10c   :  { %v6332_v18 = vadd.f32 %v6331_v15, %v6330_v7  ;;  %v6311_v21 = vpop.f32.mrf.mxu0  ;;  %5044 = vmatprep.mubr.bf16.mxu1 %v5747_v63  ;;  %v7296_v15 = vld [vmem:[#allocation5 + $0x830] sm:$0xff]   ;;  %v7306_v25 = vld [vmem:[#allocation5 + $0x858] sm:$0xff]  }
 0x10d   :  { %v6333_v22 = vpop.f32.mrf.mxu1  ;;  %v4447_v23 = vadd.f32 %v6310_v17, %v5715_v20  ;;  %6603 = vmatpush3.bf16.msra.mxu0 %v7260_v29  ;;  %v7298_v17 = vld [vmem:[#allocation5 + $0x868] sm:$0xff]   ;;  %v7302_v21 = vld [vmem:[#allocation5 + $0x860] sm:$0xff]   ;;  %v7310_v29 = vld [vmem:[#allocation5 + $0x850] sm:$0xff]  }
 0x10e   :  { %v6312_v26 = vpop.f32.mrf.mxu0  ;;  %6625 = vmatpush3.bf16.msra.mxu1 %v7261_v30  ;;  %6604 = vmatprep.subr.bf16.mxu0 %v7262_v31  ;;  %v7301_v20 = vld [vmem:[#allocation5 + $0x8a8] sm:$0xff]   ;;  %v7303_v22 = vld [vmem:[#allocation5 + $0x8e0] sm:$0xff]   ;;  %v7311_v30 = vld [vmem:[#allocation5 + $0x8d0] sm:$0xff]  }
 0x10f   :  { %v6334_v27 = vpop.f32.mrf.mxu1  ;;  %v7701_v28 = vadd.f32 %v6332_v18, %v4447_v23  ;;  %6626 = vmatprep.subr.bf16.mxu1 %v7263_v32  ;;  %v7299_v18 = vld [vmem:[#allocation5 + $0x8e8] sm:$0xff]   ;;  %v7304_v23 = vld [vmem:[#allocation5 + $0x820] sm:$0xff]   ;;  %v7307_v26 = vld [vmem:[#allocation5 + $0x8d8] sm:$0xff]  }
 0x110   :  { %v7308_v27 = vld [vmem:[#allocation5 + $0x818] sm:$0xff]   ;;  %v7312_v31 = vld [vmem:[#allocation5 + $0x810] sm:$0xff]  }
 0x111   :  { %6605 = vmatpush3.bf16.msra.mxu0 %v7264_v33  ;;  %v7313_v32 = vld [vmem:[#allocation5 + $0x890] sm:$0xff]   ;;  %v7314_v33 = vld [vmem:[#allocation5 + $0x848] sm:$0xff]  }
 0x112   :  { %6627 = vmatpush3.bf16.msra.mxu1 %v7265_v34  ;;  %6606 = vmatprep.subr.bf16.mxu0 %v7266_v35  ;;  %v7315_v34 = vld [vmem:[#allocation5 + $0x8c8] sm:$0xff]   ;;  %v7331_v63 = vld [vmem:[#allocation5 + $0x9f0] sm:$0xff]  }
 0x113   :  { %6628 = vmatprep.subr.bf16.mxu1 %v7267_v36  ;;  %v7316_v35 = vld [vmem:[#allocation5 + $0x808] sm:$0xff]  }
 0x114   :  { %v7317_v36 = vld [vmem:[#allocation5 + $0x888] sm:$0xff]  }
 0x115   :  { %6607 = vmatpush3.bf16.msra.mxu0 %v7268_v37  ;;  %v7318_v37 = vld [vmem:[#allocation5 + $0x840] sm:$0xff]  }
 0x116   :  { %6629 = vmatpush3.bf16.msra.mxu1 %v7269_v38  ;;  %6608 = vmatprep.subr.bf16.mxu0 %v7270_v39  ;;  %v7319_v38 = vld [vmem:[#allocation5 + $0x8c0] sm:$0xff]  }
 0x117   :  { %6630 = vmatprep.subr.bf16.mxu1 %v7271_v40  ;;  %v7320_v39 = vld [vmem:[#allocation5 + $0x800] sm:$0xff]  }
 0x118   :  { %v7321_v40 = vld [vmem:[#allocation5 + $0x880] sm:$0xff]  }
 0x119   :  { %6609 = vmatpush3.bf16.msra.mxu0 %v7272_v41  ;;  %v69_v41 = vld [vmem:[#allocation2 + $0x80] sm:$0xff] }
 0x11a   :  { %6631 = vmatpush3.bf16.msra.mxu1 %v7273_v42  ;;  %6610 = vmatprep.subr.bf16.mxu0 %v7274_v43  ;;  %v5748_v43 = vcombine.low %v69_v41, %v69_v41 }
 0x11b   :  { %6632 = vmatprep.subr.bf16.mxu1 %v7275_v44  ;;  %v5749_v44 = vcombine.high %v69_v41, %v69_v41  ;;  %v7365_v41 = vld [vmem:[#allocation5 + $0xab8] sm:$0xff]  }
 0x11d   :  { %6611 = vmatpush3.bf16.msra.mxu0 %v7276_v45  ;;  %v70_v45 = vld [vmem:[#allocation2 + $0x88] sm:$0xff] }
 0x11e   :  { %6633 = vmatpush3.bf16.msra.mxu1 %v7277_v46  ;;  %6612 = vmatprep.subr.bf16.mxu0 %v7278_v47  ;;  %v5750_v47 = vcombine.low %v70_v45, %v70_v45 }
 0x11f   :  { %6634 = vmatprep.subr.bf16.mxu1 %v7279_v48  ;;  %v5751_v48 = vcombine.high %v70_v45, %v70_v45 }
 0x121   :  { %6613 = vmatpush3.bf16.msra.mxu0 %v7280_v49  ;;  %v7326_v49 = vld [vmem:[#allocation5 + $0x978] sm:$0xff]  }
 0x122   :  { %6635 = vmatpush3.bf16.msra.mxu1 %v7281_v50  ;;  %6614 = vmatprep.subr.bf16.mxu0 %v7282_v51  ;;  %v7327_v51 = vld [vmem:[#allocation5 + $0x9f8] sm:$0xff]  }
 0x123   :  { %6636 = vmatprep.subr.bf16.mxu1 %v7283_v52 }
 0x125   :  { %6615 = vmatpush3.bf16.msra.mxu0 %v7284_v53 }
 0x126   :  { %6637 = vmatpush3.bf16.msra.mxu1 %v7285_v54  ;;  %6644 = vmatprep.subr.bf16.mxu0 %v7290_v62  ;;  %v7328_v54 = vld [vmem:[#allocation5 + $0x938] sm:$0xff]  }
 0x127   :  { %6666 = vmatprep.subr.bf16.mxu1 %v7291_v0 }
 0x128   :  { %v6352_v57 = vpop.f32.mrf.mxu0  ;;  %5005 = vmatmul.mubr.bf16.vlgmr.msra.gmra.mxu0 %v5744_v59 }
 0x129   :  { %v6374_v58 = vpop.f32.mrf.mxu1  ;;  %5045 = vmatmul.mubr.bf16.vlgmr.msra.gmra.mxu1 %v5746_v61  ;;  %6645 = vmatpush3.bf16.msra.mxu0 %v7292_v3  ;;  %v7334_v3 = vld [vmem:[#allocation5 + $0x968] sm:$0xff]  }
 0x12a   :  { %v6353_v1 = vpop.f32.mrf.mxu0  ;;  %6667 = vmatpush3.bf16.msra.mxu1 %v7293_v6  ;;  %6646 = vmatprep.subr.bf16.mxu0 %v7294_v10  ;;  %v7337_v6 = vld [vmem:[#allocation5 + $0x9a8] sm:$0xff]   ;;  %v7341_v10 = vld [vmem:[#allocation5 + $0x9a0] sm:$0xff]  }
 0x12b   :  { %v6375_v2 = vpop.f32.mrf.mxu1  ;;  %v6354_v4 = vadd.f32 %v6353_v1, %v6352_v57  ;;  %6668 = vmatprep.subr.bf16.mxu1 %v7295_v11  ;;  %5084 = vmatprep.mubr.bf16.mxu0 %v5749_v44  ;;  %v7329_v57 = vld [vmem:[#allocation5 + $0x9b8] sm:$0xff]   ;;  %v7332_v1 = vld [vmem:[#allocation5 + $0x930] sm:$0xff]  }
 0x12c   :  { %v6376_v5 = vadd.f32 %v6375_v2, %v6374_v58  ;;  %v6355_v7 = vpop.f32.mrf.mxu0  ;;  %5124 = vmatprep.mubr.bf16.mxu1 %v5751_v48  ;;  %v7333_v2 = vld [vmem:[#allocation5 + $0x9b0] sm:$0xff]   ;;  %v7342_v11 = vld [vmem:[#allocation5 + $0x958] sm:$0xff]  }
 0x12d   :  { %v6377_v8 = vpop.f32.mrf.mxu1  ;;  %v4527_v9 = vadd.f32 %v6354_v4, %v7701_v28  ;;  %6647 = vmatpush3.bf16.msra.mxu0 %v7296_v15  ;;  %v7309_v28 = vld [vmem:[#allocation5 + $0x898] sm:$0xff]   ;;  %v7335_v4 = vld [vmem:[#allocation5 + $0x9e8] sm:$0xff]   ;;  %v7338_v7 = vld [vmem:[#allocation5 + $0x960] sm:$0xff]  }
 0x12e   :  { %v6356_v12 = vpop.f32.mrf.mxu0  ;;  %6669 = vmatpush3.bf16.msra.mxu1 %v7297_v16  ;;  %6648 = vmatprep.subr.bf16.mxu0 %v7298_v17  ;;  %v7339_v8 = vld [vmem:[#allocation5 + $0x9e0] sm:$0xff]   ;;  %v7346_v15 = vld [vmem:[#allocation5 + $0x950] sm:$0xff]  }
 0x12f   :  { %v6378_v13 = vpop.f32.mrf.mxu1  ;;  %v7704_v14 = vadd.f32 %v6376_v5, %v4527_v9  ;;  %6670 = vmatprep.subr.bf16.mxu1 %v7299_v18  ;;  %v7336_v5 = vld [vmem:[#allocation5 + $0x928] sm:$0xff]   ;;  %v7340_v9 = vld [vmem:[#allocation5 + $0x920] sm:$0xff]   ;;  %v7343_v12 = vld [vmem:[#allocation5 + $0x9d8] sm:$0xff]  }
 0x130   :  { %v7344_v13 = vld [vmem:[#allocation5 + $0x918] sm:$0xff]   ;;  %v7347_v16 = vld [vmem:[#allocation5 + $0x9d0] sm:$0xff]  }
 0x131   :  { %6649 = vmatpush3.bf16.msra.mxu0 %v7300_v19  ;;  %v7348_v17 = vld [vmem:[#allocation5 + $0x910] sm:$0xff]   ;;  %v7350_v19 = vld [vmem:[#allocation5 + $0x948] sm:$0xff]  }
 0x132   :  { %6671 = vmatpush3.bf16.msra.mxu1 %v7301_v20  ;;  %6650 = vmatprep.subr.bf16.mxu0 %v7302_v21  ;;  %v7349_v18 = vld [vmem:[#allocation5 + $0x990] sm:$0xff]   ;;  %v7351_v20 = vld [vmem:[#allocation5 + $0x9c8] sm:$0xff]  }
 0x133   :  { %6672 = vmatprep.subr.bf16.mxu1 %v7303_v22  ;;  %v7352_v21 = vld [vmem:[#allocation5 + $0x908] sm:$0xff]  }
 0x134   :  { %v7353_v22 = vld [vmem:[#allocation5 + $0x988] sm:$0xff]  }
 0x135   :  { %6651 = vmatpush3.bf16.msra.mxu0 %v7304_v23  ;;  %v7354_v23 = vld [vmem:[#allocation5 + $0x940] sm:$0xff]  }
 0x136   :  { %6673 = vmatpush3.bf16.msra.mxu1 %v7305_v24  ;;  %6652 = vmatprep.subr.bf16.mxu0 %v7306_v25  ;;  %v7355_v24 = vld [vmem:[#allocation5 + $0x9c0] sm:$0xff]  }
 0x137   :  { %6674 = vmatprep.subr.bf16.mxu1 %v7307_v26  ;;  %v7356_v25 = vld [vmem:[#allocation5 + $0x900] sm:$0xff]  }
 0x138   :  { %v7357_v26 = vld [vmem:[#allocation5 + $0x980] sm:$0xff]  }
 0x139   :  { %6653 = vmatpush3.bf16.msra.mxu0 %v7308_v27  ;;  %v71_v27 = vld [vmem:[#allocation2 + $0x90] sm:$0xff] }
 0x13a   :  { %6675 = vmatpush3.bf16.msra.mxu1 %v7309_v28  ;;  %6654 = vmatprep.subr.bf16.mxu0 %v7310_v29  ;;  %v72_v28 = vld [vmem:[#allocation2 + $0x98] sm:$0xff] }
 0x13b   :  { %6676 = vmatprep.subr.bf16.mxu1 %v7311_v30  ;;  %v5752_v30 = vcombine.low %v71_v27, %v71_v27 }
 0x13d   :  { %6655 = vmatpush3.bf16.msra.mxu0 %v7312_v31  ;;  %v5753_v31 = vcombine.high %v71_v27, %v71_v27 }
 0x13e   :  { %6677 = vmatpush3.bf16.msra.mxu1 %v7313_v32  ;;  %6656 = vmatprep.subr.bf16.mxu0 %v7314_v33  ;;  %v5754_v32 = vcombine.low %v72_v28, %v72_v28  ;;  %v5755_v33 = vcombine.high %v72_v28, %v72_v28  ;;  %v7401_v28 = vld [vmem:[#allocation5 + $0xbb8] sm:$0xff]  }
 0x13f   :  { %6678 = vmatprep.subr.bf16.mxu1 %v7315_v34 }
 0x141   :  { %6657 = vmatpush3.bf16.msra.mxu0 %v7316_v35  ;;  %v7362_v35 = vld [vmem:[#allocation5 + $0xa78] sm:$0xff]  }
 0x142   :  { %6679 = vmatpush3.bf16.msra.mxu1 %v7317_v36  ;;  %6658 = vmatprep.subr.bf16.mxu0 %v7318_v37  ;;  %v7363_v36 = vld [vmem:[#allocation5 + $0xaf8] sm:$0xff]  }
 0x143   :  { %6680 = vmatprep.subr.bf16.mxu1 %v7319_v38  ;;  %v7364_v38 = vld [vmem:[#allocation5 + $0xa38] sm:$0xff]  }
 0x145   :  { %6659 = vmatpush3.bf16.msra.mxu0 %v7320_v39 }
 0x146   :  { %6681 = vmatpush3.bf16.msra.mxu1 %v7321_v40  ;;  %6688 = vmatprep.subr.bf16.mxu0 %v7326_v49 }
 0x147   :  { %6710 = vmatprep.subr.bf16.mxu1 %v7327_v51 }
 0x148   :  { %v6396_v42 = vpop.f32.mrf.mxu0  ;;  %5085 = vmatmul.mubr.bf16.vlgmr.msra.gmra.mxu0 %v5748_v43 }
 0x149   :  { %v6418_v46 = vpop.f32.mrf.mxu1  ;;  %5125 = vmatmul.mubr.bf16.vlgmr.msra.gmra.mxu1 %v5750_v47  ;;  %6689 = vmatpush3.bf16.msra.mxu0 %v7328_v54  ;;  %v7367_v47 = vld [vmem:[#allocation5 + $0xaf0] sm:$0xff]   ;;  %v7371_v54 = vld [vmem:[#allocation5 + $0xae8] sm:$0xff]  }
 0x14a   :  { %v6397_v50 = vpop.f32.mrf.mxu0  ;;  %6711 = vmatpush3.bf16.msra.mxu1 %v7329_v57  ;;  %6690 = vmatprep.subr.bf16.mxu0 %v7330_v60  ;;  %v7374_v57 = vld [vmem:[#allocation5 + $0xa60] sm:$0xff]  }
 0x14b   :  { %v6398_v52 = vadd.f32 %v6397_v50, %v6396_v42  ;;  %v6419_v53 = vpop.f32.mrf.mxu1  ;;  %6712 = vmatprep.subr.bf16.mxu1 %v7331_v63  ;;  %5164 = vmatprep.mubr.bf16.mxu0 %v5753_v31  ;;  %v7368_v50 = vld [vmem:[#allocation5 + $0xa30] sm:$0xff]   ;;  %v7377_v60 = vld [vmem:[#allocation5 + $0xaa0] sm:$0xff]   ;;  %v7380_v63 = vld [vmem:[#allocation5 + $0xa18] sm:$0xff]  }
 0x14c   :  { %v6420_v55 = vadd.f32 %v6419_v53, %v6418_v46  ;;  %v6399_v56 = vpop.f32.mrf.mxu0  ;;  %5204 = vmatprep.mubr.bf16.mxu1 %v5755_v33  ;;  %v7366_v46 = vld [vmem:[#allocation5 + $0xa70] sm:$0xff]   ;;  %v7370_v53 = vld [vmem:[#allocation5 + $0xa68] sm:$0xff]  }
 0x14d   :  { %v4607_v58 = vadd.f32 %v6398_v52, %v7704_v14  ;;  %v6421_v59 = vpop.f32.mrf.mxu1  ;;  %6691 = vmatpush3.bf16.msra.mxu0 %v7332_v1  ;;  %v7345_v14 = vld [vmem:[#allocation5 + $0x998] sm:$0xff]   ;;  %v7369_v52 = vld [vmem:[#allocation5 + $0xab0] sm:$0xff]   ;;  %v7373_v56 = vld [vmem:[#allocation5 + $0xaa8] sm:$0xff]  }
 0x14e   :  { %v6400_v61 = vpop.f32.mrf.mxu0  ;;  %6713 = vmatpush3.bf16.msra.mxu1 %v7333_v2  ;;  %6692 = vmatprep.subr.bf16.mxu0 %v7334_v3  ;;  %v7376_v59 = vld [vmem:[#allocation5 + $0xa20] sm:$0xff]   ;;  %v7382_v1 = vld [vmem:[#allocation5 + $0xa50] sm:$0xff]  }
 0x14f   :  { %v7707_v62 = vadd.f32 %v6420_v55, %v4607_v58  ;;  %v6422_v0 = vpop.f32.mrf.mxu1  ;;  %6714 = vmatprep.subr.bf16.mxu1 %v7335_v4  ;;  %v7372_v55 = vld [vmem:[#allocation5 + $0xa28] sm:$0xff]   ;;  %v7375_v58 = vld [vmem:[#allocation5 + $0xae0] sm:$0xff]   ;;  %v7378_v61 = vld [vmem:[#allocation5 + $0xa58] sm:$0xff]  }
 0x150   :  { %v7381_v0 = vld [vmem:[#allocation5 + $0xa98] sm:$0xff]   ;;  %v7383_v2 = vld [vmem:[#allocation5 + $0xad0] sm:$0xff]  }
 0x151   :  { %6693 = vmatpush3.bf16.msra.mxu0 %v7336_v5  ;;  %v7384_v3 = vld [vmem:[#allocation5 + $0xa10] sm:$0xff]   ;;  %v7386_v5 = vld [vmem:[#allocation5 + $0xa48] sm:$0xff]  }
 0x152   :  { %6715 = vmatpush3.bf16.msra.mxu1 %v7337_v6  ;;  %6694 = vmatprep.subr.bf16.mxu0 %v7338_v7  ;;  %v7385_v4 = vld [vmem:[#allocation5 + $0xa90] sm:$0xff]   ;;  %v7387_v6 = vld [vmem:[#allocation5 + $0xac8] sm:$0xff]  }
 0x153   :  { %6716 = vmatprep.subr.bf16.mxu1 %v7339_v8  ;;  %v7388_v7 = vld [vmem:[#allocation5 + $0xa08] sm:$0xff]   ;;  %v7403_v33 = vld [vmem:[#allocation5 + $0xbf0] sm:$0xff]  }
 0x154   :  { %v7389_v8 = vld [vmem:[#allocation5 + $0xa88] sm:$0xff]  }
 0x155   :  { %6695 = vmatpush3.bf16.msra.mxu0 %v7340_v9  ;;  %v7390_v9 = vld [vmem:[#allocation5 + $0xa40] sm:$0xff]  }
 0x156   :  { %6717 = vmatpush3.bf16.msra.mxu1 %v7341_v10  ;;  %6696 = vmatprep.subr.bf16.mxu0 %v7342_v11  ;;  %v7391_v10 = vld [vmem:[#allocation5 + $0xac0] sm:$0xff]  }
 0x157   :  { %6718 = vmatprep.subr.bf16.mxu1 %v7343_v12  ;;  %v7392_v11 = vld [vmem:[#allocation5 + $0xa00] sm:$0xff]  }
 0x158   :  { %v7393_v12 = vld [vmem:[#allocation5 + $0xa80] sm:$0xff]  }
 0x159   :  { %6697 = vmatpush3.bf16.msra.mxu0 %v7344_v13  ;;  %v73_v13 = vld [vmem:[#allocation2 + $0xa0] sm:$0xff] }
 0x15a   :  { %6719 = vmatpush3.bf16.msra.mxu1 %v7345_v14  ;;  %6698 = vmatprep.subr.bf16.mxu0 %v7346_v15  ;;  %v74_v14 = vld [vmem:[#allocation2 + $0xa8] sm:$0xff] }
 0x15b   :  { %6720 = vmatprep.subr.bf16.mxu1 %v7347_v16 }
 0x15d   :  { %6699 = vmatpush3.bf16.msra.mxu0 %v7348_v17  ;;  %v5756_v17 = vcombine.low %v73_v13, %v73_v13 }
 0x15e   :  { %6721 = vmatpush3.bf16.msra.mxu1 %v7349_v18  ;;  %6700 = vmatprep.subr.bf16.mxu0 %v7350_v19  ;;  %v5757_v18 = vcombine.high %v73_v13, %v73_v13  ;;  %v5758_v19 = vcombine.low %v74_v14, %v74_v14 }
 0x15f   :  { %6722 = vmatprep.subr.bf16.mxu1 %v7351_v20  ;;  %v7398_v20 = vld [vmem:[#allocation5 + $0xb78] sm:$0xff]  }
 0x161   :  { %6701 = vmatpush3.bf16.msra.mxu0 %v7352_v21  ;;  %v5759_v21 = vcombine.high %v74_v14, %v74_v14 }
 0x162   :  { %6723 = vmatpush3.bf16.msra.mxu1 %v7353_v22  ;;  %6702 = vmatprep.subr.bf16.mxu0 %v7354_v23  ;;  %v7399_v22 = vld [vmem:[#allocation5 + $0xbf8] sm:$0xff]  }
 0x163   :  { %6724 = vmatprep.subr.bf16.mxu1 %v7355_v24 }
 0x165   :  { %6703 = vmatpush3.bf16.msra.mxu0 %v7356_v25  ;;  %v7400_v25 = vld [vmem:[#allocation5 + $0xb38] sm:$0xff]  }
 0x166   :  { %6725 = vmatpush3.bf16.msra.mxu1 %v7357_v26  ;;  %6732 = vmatprep.subr.bf16.mxu0 %v7362_v35 }
 0x167   :  { %6754 = vmatprep.subr.bf16.mxu1 %v7363_v36 }
 0x168   :  { %v6440_v29 = vpop.f32.mrf.mxu0  ;;  %5165 = vmatmul.mubr.bf16.vlgmr.msra.gmra.mxu0 %v5752_v30 }
 0x169   :  { %v6462_v34 = vpop.f32.mrf.mxu1  ;;  %5205 = vmatmul.mubr.bf16.vlgmr.msra.gmra.mxu1 %v5754_v32  ;;  %6733 = vmatpush3.bf16.msra.mxu0 %v7364_v38  ;;  %v7402_v32 = vld [vmem:[#allocation5 + $0xb70] sm:$0xff]  }
 0x16a   :  { %v6441_v37 = vpop.f32.mrf.mxu0  ;;  %6755 = vmatpush3.bf16.msra.mxu1 %v7365_v41  ;;  %6734 = vmatprep.subr.bf16.mxu0 %v7366_v46  ;;  %v7405_v38 = vld [vmem:[#allocation5 + $0xbb0] sm:$0xff]   ;;  %v7408_v41 = vld [vmem:[#allocation5 + $0xb28] sm:$0xff]   ;;  %v7413_v46 = vld [vmem:[#allocation5 + $0xba0] sm:$0xff]  }
 0x16b   :  { %v6442_v39 = vadd.f32 %v6441_v37, %v6440_v29  ;;  %v6463_v40 = vpop.f32.mrf.mxu1  ;;  %6756 = vmatprep.subr.bf16.mxu1 %v7367_v47  ;;  %5244 = vmatprep.mubr.bf16.mxu0 %v5757_v18  ;;  %v7404_v37 = vld [vmem:[#allocation5 + $0xb30] sm:$0xff]   ;;  %v7414_v47 = vld [vmem:[#allocation5 + $0xb58] sm:$0xff]  }
 0x16c   :  { %v6464_v42 = vadd.f32 %v6463_v40, %v6462_v34  ;;  %v6443_v43 = vpop.f32.mrf.mxu0  ;;  %5284 = vmatprep.mubr.bf16.mxu1 %v5759_v21  ;;  %v7407_v40 = vld [vmem:[#allocation5 + $0xbe8] sm:$0xff]   ;;  %v7438_v18 = vld [vmem:[#allocation5 + $0xc70] sm:$0xff]  }
 0x16d   :  { %v4687_v44 = vadd.f32 %v6442_v39, %v7707_v62  ;;  %v6465_v45 = vpop.f32.mrf.mxu1  ;;  %6735 = vmatpush3.bf16.msra.mxu0 %v7368_v50  ;;  %v7379_v62 = vld [vmem:[#allocation5 + $0xad8] sm:$0xff]   ;;  %v7406_v39 = vld [vmem:[#allocation5 + $0xb68] sm:$0xff]   ;;  %v7410_v43 = vld [vmem:[#allocation5 + $0xb60] sm:$0xff]  }
 0x16e   :  { %v6444_v48 = vpop.f32.mrf.mxu0  ;;  %6757 = vmatpush3.bf16.msra.mxu1 %v7369_v52  ;;  %6736 = vmatprep.subr.bf16.mxu0 %v7370_v53  ;;  %v7412_v45 = vld [vmem:[#allocation5 + $0xb20] sm:$0xff]   ;;  %v7417_v50 = vld [vmem:[#allocation5 + $0xb98] sm:$0xff]   ;;  %v7419_v52 = vld [vmem:[#allocation5 + $0xbd0] sm:$0xff]  }
 0x16f   :  { %v7710_v49 = vadd.f32 %v6464_v42, %v4687_v44  ;;  %v6466_v51 = vpop.f32.mrf.mxu1  ;;  %6758 = vmatprep.subr.bf16.mxu1 %v7371_v54  ;;  %v7409_v42 = vld [vmem:[#allocation5 + $0xba8] sm:$0xff]   ;;  %v7411_v44 = vld [vmem:[#allocation5 + $0xbe0] sm:$0xff]   ;;  %v7415_v48 = vld [vmem:[#allocation5 + $0xbd8] sm:$0xff]  }
 0x170   :  { %v7418_v51 = vld [vmem:[#allocation5 + $0xb50] sm:$0xff]  }
 0x171   :  { %6737 = vmatpush3.bf16.msra.mxu0 %v7372_v55  ;;  %v7420_v53 = vld [vmem:[#allocation5 + $0xb10] sm:$0xff]   ;;  %v7422_v55 = vld [vmem:[#allocation5 + $0xb48] sm:$0xff]  }
 0x172   :  { %6759 = vmatpush3.bf16.msra.mxu1 %v7373_v56  ;;  %6738 = vmatprep.subr.bf16.mxu0 %v7374_v57  ;;  %v7421_v54 = vld [vmem:[#allocation5 + $0xb90] sm:$0xff]   ;;  %v7423_v56 = vld [vmem:[#allocation5 + $0xbc8] sm:$0xff]  }
 0x173   :  { %6760 = vmatprep.subr.bf16.mxu1 %v7375_v58  ;;  %v7424_v57 = vld [vmem:[#allocation5 + $0xb08] sm:$0xff]   ;;  %v7439_v21 = vld [vmem:[#allocation5 + $0xcf0] sm:$0xff]  }
 0x174   :  { %v7425_v58 = vld [vmem:[#allocation5 + $0xb88] sm:$0xff]  }
 0x175   :  { %6739 = vmatpush3.bf16.msra.mxu0 %v7376_v59  ;;  %v7426_v59 = vld [vmem:[#allocation5 + $0xb40] sm:$0xff]  }
 0x176   :  { %6761 = vmatpush3.bf16.msra.mxu1 %v7377_v60  ;;  %6740 = vmatprep.subr.bf16.mxu0 %v7378_v61  ;;  %v7427_v60 = vld [vmem:[#allocation5 + $0xbc0] sm:$0xff]  }
 0x177   :  { %6762 = vmatprep.subr.bf16.mxu1 %v7379_v62  ;;  %v7428_v61 = vld [vmem:[#allocation5 + $0xb00] sm:$0xff]  }
 0x178   :  { %v7429_v62 = vld [vmem:[#allocation5 + $0xb80] sm:$0xff]  }
 0x179   :  { %6741 = vmatpush3.bf16.msra.mxu0 %v7380_v63  ;;  %v75_v63 = vld [vmem:[#allocation2 + $0xb0] sm:$0xff] }
 0x17a   :  { %6763 = vmatpush3.bf16.msra.mxu1 %v7381_v0  ;;  %6742 = vmatprep.subr.bf16.mxu0 %v7382_v1  ;;  %v5760_v1 = vcombine.low %v75_v63, %v75_v63 }
 0x17b   :  { %6764 = vmatprep.subr.bf16.mxu1 %v7383_v2  ;;  %v5761_v2 = vcombine.high %v75_v63, %v75_v63  ;;  %v7473_v63 = vld [vmem:[#allocation5 + $0xdb8] sm:$0xff]  }
 0x17d   :  { %6743 = vmatpush3.bf16.msra.mxu0 %v7384_v3  ;;  %v76_v3 = vld [vmem:[#allocation2 + $0xb8] sm:$0xff] }
 0x17e   :  { %6765 = vmatpush3.bf16.msra.mxu1 %v7385_v4  ;;  %6744 = vmatprep.subr.bf16.mxu0 %v7386_v5  ;;  %v5762_v5 = vcombine.low %v76_v3, %v76_v3 }
 0x17f   :  { %6766 = vmatprep.subr.bf16.mxu1 %v7387_v6  ;;  %v5763_v6 = vcombine.high %v76_v3, %v76_v3 }
 0x181   :  { %6745 = vmatpush3.bf16.msra.mxu0 %v7388_v7  ;;  %v7434_v7 = vld [vmem:[#allocation5 + $0xc78] sm:$0xff]  }
 0x182   :  { %6767 = vmatpush3.bf16.msra.mxu1 %v7389_v8  ;;  %6746 = vmatprep.subr.bf16.mxu0 %v7390_v9  ;;  %v7435_v9 = vld [vmem:[#allocation5 + $0xcf8] sm:$0xff]  }
 0x183   :  { %6768 = vmatprep.subr.bf16.mxu1 %v7391_v10 }
 0x185   :  { %6747 = vmatpush3.bf16.msra.mxu0 %v7392_v11 }
 0x186   :  { %6769 = vmatpush3.bf16.msra.mxu1 %v7393_v12  ;;  %6776 = vmatprep.subr.bf16.mxu0 %v7398_v20  ;;  %v7436_v12 = vld [vmem:[#allocation5 + $0xc38] sm:$0xff]  }
 0x187   :  { %6798 = vmatprep.subr.bf16.mxu1 %v7399_v22 }
 0x188   :  { %v6484_v15 = vpop.f32.mrf.mxu0  ;;  %5245 = vmatmul.mubr.bf16.vlgmr.msra.gmra.mxu0 %v5756_v17 }
 0x189   :  { %v6506_v16 = vpop.f32.mrf.mxu1  ;;  %5285 = vmatmul.mubr.bf16.vlgmr.msra.gmra.mxu1 %v5758_v19  ;;  %6777 = vmatpush3.bf16.msra.mxu0 %v7400_v25  ;;  %v7442_v25 = vld [vmem:[#allocation5 + $0xc68] sm:$0xff]  }
 0x18a   :  { %v6485_v23 = vpop.f32.mrf.mxu0  ;;  %6799 = vmatpush3.bf16.msra.mxu1 %v7401_v28  ;;  %6778 = vmatprep.subr.bf16.mxu0 %v7402_v32  ;;  %v7445_v28 = vld [vmem:[#allocation5 + $0xca8] sm:$0xff]   ;;  %v7449_v32 = vld [vmem:[#allocation5 + $0xca0] sm:$0xff]  }
 0x18b   :  { %v6507_v24 = vpop.f32.mrf.mxu1  ;;  %v6486_v26 = vadd.f32 %v6485_v23, %v6484_v15  ;;  %6800 = vmatprep.subr.bf16.mxu1 %v7403_v33  ;;  %5324 = vmatprep.mubr.bf16.mxu0 %v5761_v2  ;;  %v7437_v15 = vld [vmem:[#allocation5 + $0xcb8] sm:$0xff]   ;;  %v7440_v23 = vld [vmem:[#allocation5 + $0xc30] sm:$0xff]  }
 0x18c   :  { %v6508_v27 = vadd.f32 %v6507_v24, %v6506_v16  ;;  %v6487_v29 = vpop.f32.mrf.mxu0  ;;  %5364 = vmatprep.mubr.bf16.mxu1 %v5763_v6  ;;  %v7441_v24 = vld [vmem:[#allocation5 + $0xcb0] sm:$0xff]   ;;  %v7450_v33 = vld [vmem:[#allocation5 + $0xc58] sm:$0xff]  }
 0x18d   :  { %v6509_v30 = vpop.f32.mrf.mxu1  ;;  %v4767_v31 = vadd.f32 %v6486_v26, %v7710_v49  ;;  %6779 = vmatpush3.bf16.msra.mxu0 %v7404_v37  ;;  %v7416_v49 = vld [vmem:[#allocation5 + $0xb18] sm:$0xff]   ;;  %v7443_v26 = vld [vmem:[#allocation5 + $0xce8] sm:$0xff]   ;;  %v7446_v29 = vld [vmem:[#allocation5 + $0xc60] sm:$0xff]  }
 0x18e   :  { %v6488_v34 = vpop.f32.mrf.mxu0  ;;  %6801 = vmatpush3.bf16.msra.mxu1 %v7405_v38  ;;  %6780 = vmatprep.subr.bf16.mxu0 %v7406_v39  ;;  %v7447_v30 = vld [vmem:[#allocation5 + $0xce0] sm:$0xff]   ;;  %v7454_v37 = vld [vmem:[#allocation5 + $0xc50] sm:$0xff]  }
 0x18f   :  { %v6510_v35 = vpop.f32.mrf.mxu1  ;;  %v7713_v36 = vadd.f32 %v6508_v27, %v4767_v31  ;;  %6802 = vmatprep.subr.bf16.mxu1 %v7407_v40  ;;  %v7444_v27 = vld [vmem:[#allocation5 + $0xc28] sm:$0xff]   ;;  %v7448_v31 = vld [vmem:[#allocation5 + $0xc20] sm:$0xff]   ;;  %v7451_v34 = vld [vmem:[#allocation5 + $0xcd8] sm:$0xff]  }
 0x190   :  { %v7452_v35 = vld [vmem:[#allocation5 + $0xc18] sm:$0xff]   ;;  %v7455_v38 = vld [vmem:[#allocation5 + $0xcd0] sm:$0xff]  }
 0x191   :  { %6781 = vmatpush3.bf16.msra.mxu0 %v7408_v41  ;;  %v7456_v39 = vld [vmem:[#allocation5 + $0xc10] sm:$0xff]   ;;  %v7458_v41 = vld [vmem:[#allocation5 + $0xc48] sm:$0xff]  }
 0x192   :  { %6803 = vmatpush3.bf16.msra.mxu1 %v7409_v42  ;;  %6782 = vmatprep.subr.bf16.mxu0 %v7410_v43  ;;  %v7457_v40 = vld [vmem:[#allocation5 + $0xc90] sm:$0xff]   ;;  %v7459_v42 = vld [vmem:[#allocation5 + $0xcc8] sm:$0xff]  }
 0x193   :  { %6804 = vmatprep.subr.bf16.mxu1 %v7411_v44  ;;  %v7460_v43 = vld [vmem:[#allocation5 + $0xc08] sm:$0xff]  }
 0x194   :  { %v7461_v44 = vld [vmem:[#allocation5 + $0xc88] sm:$0xff]  }
 0x195   :  { %6783 = vmatpush3.bf16.msra.mxu0 %v7412_v45  ;;  %v7462_v45 = vld [vmem:[#allocation5 + $0xc40] sm:$0xff]  }
 0x196   :  { %6805 = vmatpush3.bf16.msra.mxu1 %v7413_v46  ;;  %6784 = vmatprep.subr.bf16.mxu0 %v7414_v47  ;;  %v7463_v46 = vld [vmem:[#allocation5 + $0xcc0] sm:$0xff]  }
 0x197   :  { %6806 = vmatprep.subr.bf16.mxu1 %v7415_v48  ;;  %v7464_v47 = vld [vmem:[#allocation5 + $0xc00] sm:$0xff]  }
 0x198   :  { %v7465_v48 = vld [vmem:[#allocation5 + $0xc80] sm:$0xff]  }
 0x199   :  { %6785 = vmatpush3.bf16.msra.mxu0 %v7416_v49  ;;  %v77_v49 = vld [vmem:[#allocation2 + $0xc0] sm:$0xff] }
 0x19a   :  { %6807 = vmatpush3.bf16.msra.mxu1 %v7417_v50  ;;  %6786 = vmatprep.subr.bf16.mxu0 %v7418_v51  ;;  %v78_v50 = vld [vmem:[#allocation2 + $0xc8] sm:$0xff] }
 0x19b   :  { %6808 = vmatprep.subr.bf16.mxu1 %v7419_v52  ;;  %v5764_v52 = vcombine.low %v77_v49, %v77_v49 }
 0x19d   :  { %6787 = vmatpush3.bf16.msra.mxu0 %v7420_v53  ;;  %v5765_v53 = vcombine.high %v77_v49, %v77_v49  ;;  %v7509_v49 = vld [vmem:[#allocation5 + $0xeb8] sm:$0xff]  }
 0x19e   :  { %6809 = vmatpush3.bf16.msra.mxu1 %v7421_v54  ;;  %6788 = vmatprep.subr.bf16.mxu0 %v7422_v55  ;;  %v5766_v54 = vcombine.low %v78_v50, %v78_v50  ;;  %v5767_v55 = vcombine.high %v78_v50, %v78_v50 }
 0x19f   :  { %6810 = vmatprep.subr.bf16.mxu1 %v7423_v56 }
 0x1a1   :  { %6789 = vmatpush3.bf16.msra.mxu0 %v7424_v57  ;;  %v7470_v57 = vld [vmem:[#allocation5 + $0xd78] sm:$0xff]  }
 0x1a2   :  { %6811 = vmatpush3.bf16.msra.mxu1 %v7425_v58  ;;  %6790 = vmatprep.subr.bf16.mxu0 %v7426_v59  ;;  %v7471_v58 = vld [vmem:[#allocation5 + $0xdf8] sm:$0xff]  }
 0x1a3   :  { %6812 = vmatprep.subr.bf16.mxu1 %v7427_v60  ;;  %v7472_v60 = vld [vmem:[#allocation5 + $0xd38] sm:$0xff]  }
 0x1a5   :  { %6791 = vmatpush3.bf16.msra.mxu0 %v7428_v61 }
 0x1a6   :  { %6813 = vmatpush3.bf16.msra.mxu1 %v7429_v62  ;;  %6820 = vmatprep.subr.bf16.mxu0 %v7434_v7 }
 0x1a7   :  { %6842 = vmatprep.subr.bf16.mxu1 %v7435_v9 }
 0x1a8   :  { %v6528_v0 = vpop.f32.mrf.mxu0  ;;  %5325 = vmatmul.mubr.bf16.vlgmr.msra.gmra.mxu0 %v5760_v1 }
 0x1a9   :  { %v6550_v4 = vpop.f32.mrf.mxu1  ;;  %5365 = vmatmul.mubr.bf16.vlgmr.msra.gmra.mxu1 %v5762_v5  ;;  %6821 = vmatpush3.bf16.msra.mxu0 %v7436_v12  ;;  %v7475_v5 = vld [vmem:[#allocation5 + $0xdf0] sm:$0xff]   ;;  %v7479_v12 = vld [vmem:[#allocation5 + $0xde8] sm:$0xff]  }
 0x1aa   :  { %v6529_v8 = vpop.f32.mrf.mxu0  ;;  %6843 = vmatpush3.bf16.msra.mxu1 %v7437_v15  ;;  %6822 = vmatprep.subr.bf16.mxu0 %v7438_v18  ;;  %v7482_v15 = vld [vmem:[#allocation5 + $0xd60] sm:$0xff]  }
 0x1ab   :  { %v6530_v10 = vadd.f32 %v6529_v8, %v6528_v0  ;;  %v6551_v11 = vpop.f32.mrf.mxu1  ;;  %6844 = vmatprep.subr.bf16.mxu1 %v7439_v21  ;;  %5404 = vmatprep.mubr.bf16.mxu0 %v5765_v53  ;;  %v7476_v8 = vld [vmem:[#allocation5 + $0xd30] sm:$0xff]   ;;  %v7485_v18 = vld [vmem:[#allocation5 + $0xda0] sm:$0xff]   ;;  %v7488_v21 = vld [vmem:[#allocation5 + $0xd18] sm:$0xff]  }
 0x1ac   :  { %v6552_v13 = vadd.f32 %v6551_v11, %v6550_v4  ;;  %v6531_v14 = vpop.f32.mrf.mxu0  ;;  %5444 = vmatprep.mubr.bf16.mxu1 %v5767_v55  ;;  %v7474_v4 = vld [vmem:[#allocation5 + $0xd70] sm:$0xff]   ;;  %v7478_v11 = vld [vmem:[#allocation5 + $0xd68] sm:$0xff]  }
 0x1ad   :  { %v4847_v16 = vadd.f32 %v6530_v10, %v7713_v36  ;;  %v6553_v17 = vpop.f32.mrf.mxu1  ;;  %6823 = vmatpush3.bf16.msra.mxu0 %v7440_v23  ;;  %v7453_v36 = vld [vmem:[#allocation5 + $0xc98] sm:$0xff]   ;;  %v7477_v10 = vld [vmem:[#allocation5 + $0xdb0] sm:$0xff]   ;;  %v7481_v14 = vld [vmem:[#allocation5 + $0xda8] sm:$0xff]  }
 0x1ae   :  { %v6532_v19 = vpop.f32.mrf.mxu0  ;;  %6845 = vmatpush3.bf16.msra.mxu1 %v7441_v24  ;;  %6824 = vmatprep.subr.bf16.mxu0 %v7442_v25  ;;  %v7484_v17 = vld [vmem:[#allocation5 + $0xd20] sm:$0xff]   ;;  %v7490_v23 = vld [vmem:[#allocation5 + $0xd50] sm:$0xff]  }
 0x1af   :  { %v7716_v20 = vadd.f32 %v6552_v13, %v4847_v16  ;;  %v6554_v22 = vpop.f32.mrf.mxu1  ;;  %6846 = vmatprep.subr.bf16.mxu1 %v7443_v26  ;;  %v7480_v13 = vld [vmem:[#allocation5 + $0xd28] sm:$0xff]   ;;  %v7483_v16 = vld [vmem:[#allocation5 + $0xde0] sm:$0xff]   ;;  %v7486_v19 = vld [vmem:[#allocation5 + $0xd58] sm:$0xff]  }
 0x1b0   :  { %v7489_v22 = vld [vmem:[#allocation5 + $0xd98] sm:$0xff]   ;;  %v7491_v24 = vld [vmem:[#allocation5 + $0xdd0] sm:$0xff]  }
 0x1b1   :  { %6825 = vmatpush3.bf16.msra.mxu0 %v7444_v27  ;;  %v7492_v25 = vld [vmem:[#allocation5 + $0xd10] sm:$0xff]   ;;  %v7494_v27 = vld [vmem:[#allocation5 + $0xd48] sm:$0xff]  }
 0x1b2   :  { %6847 = vmatpush3.bf16.msra.mxu1 %v7445_v28  ;;  %6826 = vmatprep.subr.bf16.mxu0 %v7446_v29  ;;  %v7493_v26 = vld [vmem:[#allocation5 + $0xd90] sm:$0xff]   ;;  %v7495_v28 = vld [vmem:[#allocation5 + $0xdc8] sm:$0xff]  }
 0x1b3   :  { %6848 = vmatprep.subr.bf16.mxu1 %v7447_v30  ;;  %v7496_v29 = vld [vmem:[#allocation5 + $0xd08] sm:$0xff]   ;;  %v7511_v55 = vld [vmem:[#allocation5 + $0xef0] sm:$0xff]  }
 0x1b4   :  { %v7497_v30 = vld [vmem:[#allocation5 + $0xd88] sm:$0xff]  }
 0x1b5   :  { %6827 = vmatpush3.bf16.msra.mxu0 %v7448_v31  ;;  %v7498_v31 = vld [vmem:[#allocation5 + $0xd40] sm:$0xff]  }
 0x1b6   :  { %6849 = vmatpush3.bf16.msra.mxu1 %v7449_v32  ;;  %6828 = vmatprep.subr.bf16.mxu0 %v7450_v33  ;;  %v7499_v32 = vld [vmem:[#allocation5 + $0xdc0] sm:$0xff]  }
 0x1b7   :  { %6850 = vmatprep.subr.bf16.mxu1 %v7451_v34  ;;  %v7500_v33 = vld [vmem:[#allocation5 + $0xd00] sm:$0xff]  }
 0x1b8   :  { %v7501_v34 = vld [vmem:[#allocation5 + $0xd80] sm:$0xff]  }
 0x1b9   :  { %6829 = vmatpush3.bf16.msra.mxu0 %v7452_v35  ;;  %v79_v35 = vld [vmem:[#allocation2 + $0xd0] sm:$0xff] }
 0x1ba   :  { %6851 = vmatpush3.bf16.msra.mxu1 %v7453_v36  ;;  %6830 = vmatprep.subr.bf16.mxu0 %v7454_v37  ;;  %v80_v36 = vld [vmem:[#allocation2 + $0xd8] sm:$0xff] }
 0x1bb   :  { %6852 = vmatprep.subr.bf16.mxu1 %v7455_v38  ;;  %v5768_v38 = vcombine.low %v79_v35, %v79_v35 }
 0x1bd   :  { %6831 = vmatpush3.bf16.msra.mxu0 %v7456_v39  ;;  %v5769_v39 = vcombine.high %v79_v35, %v79_v35 }
 0x1be   :  { %6853 = vmatpush3.bf16.msra.mxu1 %v7457_v40  ;;  %6832 = vmatprep.subr.bf16.mxu0 %v7458_v41  ;;  %v5770_v40 = vcombine.low %v80_v36, %v80_v36 }
 0x1bf   :  { %6854 = vmatprep.subr.bf16.mxu1 %v7459_v42  ;;  %v7506_v42 = vld [vmem:[#allocation5 + $0xe78] sm:$0xff]  }
 0x1c1   :  { %6833 = vmatpush3.bf16.msra.mxu0 %v7460_v43  ;;  %v5771_v43 = vcombine.high %v80_v36, %v80_v36  ;;  %v7545_v36 = vld [vmem:[#allocation5 + $0xfb8] sm:$0xff]  }
 0x1c2   :  { %6855 = vmatpush3.bf16.msra.mxu1 %v7461_v44  ;;  %6834 = vmatprep.subr.bf16.mxu0 %v7462_v45  ;;  %v7507_v44 = vld [vmem:[#allocation5 + $0xef8] sm:$0xff]  }
 0x1c3   :  { %6856 = vmatprep.subr.bf16.mxu1 %v7463_v46  ;;  %v7508_v46 = vld [vmem:[#allocation5 + $0xe38] sm:$0xff]  }
 0x1c5   :  { %6835 = vmatpush3.bf16.msra.mxu0 %v7464_v47 }
 0x1c6   :  { %6857 = vmatpush3.bf16.msra.mxu1 %v7465_v48  ;;  %6864 = vmatprep.subr.bf16.mxu0 %v7470_v57 }
 0x1c7   :  { %6886 = vmatprep.subr.bf16.mxu1 %v7471_v58  ;;  %v7512_v58 = vld [vmem:[#allocation5 + $0xe30] sm:$0xff]  }
 0x1c8   :  { %v6572_v51 = vpop.f32.mrf.mxu0  ;;  %5405 = vmatmul.mubr.bf16.vlgmr.msra.gmra.mxu0 %v5764_v52 }
 0x1c9   :  { %v6594_v56 = vpop.f32.mrf.mxu1  ;;  %5445 = vmatmul.mubr.bf16.vlgmr.msra.gmra.mxu1 %v5766_v54  ;;  %6865 = vmatpush3.bf16.msra.mxu0 %v7472_v60  ;;  %v7510_v54 = vld [vmem:[#allocation5 + $0xe70] sm:$0xff]  }
 0x1ca   :  { %v6573_v59 = vpop.f32.mrf.mxu0  ;;  %6887 = vmatpush3.bf16.msra.mxu1 %v7473_v63  ;;  %6866 = vmatprep.subr.bf16.mxu0 %v7474_v4  ;;  %v7513_v60 = vld [vmem:[#allocation5 + $0xeb0] sm:$0xff]   ;;  %v7516_v63 = vld [vmem:[#allocation5 + $0xe28] sm:$0xff]   ;;  %v7521_v4 = vld [vmem:[#allocation5 + $0xea0] sm:$0xff]  }
 0x1cb   :  { %v6574_v61 = vadd.f32 %v6573_v59, %v6572_v51  ;;  %v6595_v62 = vpop.f32.mrf.mxu1  ;;  %6888 = vmatprep.subr.bf16.mxu1 %v7475_v5  ;;  %5484 = vmatprep.mubr.bf16.mxu0 %v5769_v39  ;;  %v7522_v5 = vld [vmem:[#allocation5 + $0xe58] sm:$0xff]  }
 0x1cc   :  { %v6596_v0 = vadd.f32 %v6595_v62, %v6594_v56  ;;  %v6575_v1 = vpop.f32.mrf.mxu0  ;;  %5524 = vmatprep.mubr.bf16.mxu1 %v5771_v43  ;;  %v7515_v62 = vld [vmem:[#allocation5 + $0xee8] sm:$0xff]  }
 0x1cd   :  { %v4927_v2 = vadd.f32 %v6574_v61, %v7716_v20  ;;  %v6597_v3 = vpop.f32.mrf.mxu1  ;;  %6867 = vmatpush3.bf16.msra.mxu0 %v7476_v8  ;;  %v7487_v20 = vld [vmem:[#allocation5 + $0xdd8] sm:$0xff]   ;;  %v7514_v61 = vld [vmem:[#allocation5 + $0xe68] sm:$0xff]   ;;  %v7518_v1 = vld [vmem:[#allocation5 + $0xe60] sm:$0xff]  }
 0x1ce   :  { %v6576_v6 = vpop.f32.mrf.mxu0  ;;  %6889 = vmatpush3.bf16.msra.mxu1 %v7477_v10  ;;  %6868 = vmatprep.subr.bf16.mxu0 %v7478_v11  ;;  %v7520_v3 = vld [vmem:[#allocation5 + $0xe20] sm:$0xff]   ;;  %v7525_v8 = vld [vmem:[#allocation5 + $0xe98] sm:$0xff]   ;;  %v7527_v10 = vld [vmem:[#allocation5 + $0xed0] sm:$0xff]  }
 0x1cf   :  { %v7719_v7 = vadd.f32 %v6596_v0, %v4927_v2  ;;  %v6598_v9 = vpop.f32.mrf.mxu1  ;;  %6890 = vmatprep.subr.bf16.mxu1 %v7479_v12  ;;  %v7517_v0 = vld [vmem:[#allocation5 + $0xea8] sm:$0xff]   ;;  %v7519_v2 = vld [vmem:[#allocation5 + $0xee0] sm:$0xff]   ;;  %v7523_v6 = vld [vmem:[#allocation5 + $0xed8] sm:$0xff]  }
 0x1d0   :  { %v7526_v9 = vld [vmem:[#allocation5 + $0xe50] sm:$0xff]  }
 0x1d1   :  { %6869 = vmatpush3.bf16.msra.mxu0 %v7480_v13  ;;  %v7528_v11 = vld [vmem:[#allocation5 + $0xe10] sm:$0xff]   ;;  %v7530_v13 = vld [vmem:[#allocation5 + $0xe48] sm:$0xff]  }
 0x1d2   :  { %6891 = vmatpush3.bf16.msra.mxu1 %v7481_v14  ;;  %6870 = vmatprep.subr.bf16.mxu0 %v7482_v15  ;;  %v7529_v12 = vld [vmem:[#allocation5 + $0xe90] sm:$0xff]   ;;  %v7531_v14 = vld [vmem:[#allocation5 + $0xec8] sm:$0xff]  }
 0x1d3   :  { %6892 = vmatprep.subr.bf16.mxu1 %v7483_v16  ;;  %v7532_v15 = vld [vmem:[#allocation5 + $0xe08] sm:$0xff]  }
 0x1d4   :  { %v7533_v16 = vld [vmem:[#allocation5 + $0xe88] sm:$0xff]  }
 0x1d5   :  { %6871 = vmatpush3.bf16.msra.mxu0 %v7484_v17  ;;  %v7534_v17 = vld [vmem:[#allocation5 + $0xe40] sm:$0xff]  }
 0x1d6   :  { %6893 = vmatpush3.bf16.msra.mxu1 %v7485_v18  ;;  %6872 = vmatprep.subr.bf16.mxu0 %v7486_v19  ;;  %v7535_v18 = vld [vmem:[#allocation5 + $0xec0] sm:$0xff]  }
 0x1d7   :  { %6894 = vmatprep.subr.bf16.mxu1 %v7487_v20  ;;  %v7536_v19 = vld [vmem:[#allocation5 + $0xe00] sm:$0xff]  }
 0x1d8   :  { %v7537_v20 = vld [vmem:[#allocation5 + $0xe80] sm:$0xff]  }
 0x1d9   :  { %6873 = vmatpush3.bf16.msra.mxu0 %v7488_v21  ;;  %v81_v21 = vld [vmem:[#allocation2 + $0xe0] sm:$0xff] }
 0x1da   :  { %6895 = vmatpush3.bf16.msra.mxu1 %v7489_v22  ;;  %6874 = vmatprep.subr.bf16.mxu0 %v7490_v23  ;;  %v5772_v22 = vcombine.low %v81_v21, %v81_v21  ;;  %v5773_v23 = vcombine.high %v81_v21, %v81_v21 }
 0x1db   :  { %6896 = vmatprep.subr.bf16.mxu1 %v7491_v24  ;;  %v82_v24 = vld [vmem:[#allocation2 + $0xe8] sm:$0xff] }
 0x1dd   :  { %6875 = vmatpush3.bf16.msra.mxu0 %v7492_v25 }
 0x1de   :  { %6897 = vmatpush3.bf16.msra.mxu1 %v7493_v26  ;;  %6876 = vmatprep.subr.bf16.mxu0 %v7494_v27  ;;  %v5774_v27 = vcombine.low %v82_v24, %v82_v24 }
 0x1df   :  { %6898 = vmatprep.subr.bf16.mxu1 %v7495_v28  ;;  %v5775_v28 = vcombine.high %v82_v24, %v82_v24 }
 0x1e1   :  { %6877 = vmatpush3.bf16.msra.mxu0 %v7496_v29  ;;  %v7542_v29 = vld [vmem:[#allocation5 + $0xf78] sm:$0xff]  }
 0x1e2   :  { %6899 = vmatpush3.bf16.msra.mxu1 %v7497_v30  ;;  %6878 = vmatprep.subr.bf16.mxu0 %v7498_v31  ;;  %v7543_v30 = vld [vmem:[#allocation5 + $0xff8] sm:$0xff]  }
 0x1e3   :  { %6900 = vmatprep.subr.bf16.mxu1 %v7499_v32 }
 0x1e5   :  { %6879 = vmatpush3.bf16.msra.mxu0 %v7500_v33  ;;  %v7544_v33 = vld [vmem:[#allocation5 + $0xf38] sm:$0xff]  }
 0x1e6   :  { %6901 = vmatpush3.bf16.msra.mxu1 %v7501_v34  ;;  %6908 = vmatprep.subr.bf16.mxu0 %v7506_v42 }
 0x1e7   :  { %6930 = vmatprep.subr.bf16.mxu1 %v7507_v44 }
 0x1e8   :  { %v6616_v37 = vpop.f32.mrf.mxu0  ;;  %5485 = vmatmul.mubr.bf16.vlgmr.msra.gmra.mxu0 %v5768_v38 }
 0x1e9   :  { %v6638_v41 = vpop.f32.mrf.mxu1  ;;  %5525 = vmatmul.mubr.bf16.vlgmr.msra.gmra.mxu1 %v5770_v40  ;;  %6909 = vmatpush3.bf16.msra.mxu0 %v7508_v46  ;;  %v7546_v40 = vld [vmem:[#allocation5 + $0xf70] sm:$0xff]  }
 0x1ea   :  { %v6617_v45 = vpop.f32.mrf.mxu0  ;;  %6931 = vmatpush3.bf16.msra.mxu1 %v7509_v49  ;;  %6910 = vmatprep.subr.bf16.mxu0 %v7510_v54  ;;  %v7549_v46 = vld [vmem:[#allocation5 + $0xfb0] sm:$0xff]   ;;  %v7552_v49 = vld [vmem:[#allocation5 + $0xf28] sm:$0xff]   ;;  %v7557_v54 = vld [vmem:[#allocation5 + $0xfa0] sm:$0xff]  }
 0x1eb   :  { %v6618_v47 = vadd.f32 %v6617_v45, %v6616_v37  ;;  %v6639_v48 = vpop.f32.mrf.mxu1  ;;  %6932 = vmatprep.subr.bf16.mxu1 %v7511_v55  ;;  %5564 = vmatprep.mubr.bf16.mxu0 %v5773_v23  ;;  %v7548_v45 = vld [vmem:[#allocation5 + $0xf30] sm:$0xff]   ;;  %v7558_v55 = vld [vmem:[#allocation5 + $0xf58] sm:$0xff]  }
 0x1ec   :  { %v6640_v50 = vadd.f32 %v6639_v48, %v6638_v41  ;;  %v6619_v51 = vpop.f32.mrf.mxu0  ;;  %5604 = vmatprep.mubr.bf16.mxu1 %v5775_v28  ;;  %v7547_v41 = vld [vmem:[#allocation5 + $0xff0] sm:$0xff]   ;;  %v7551_v48 = vld [vmem:[#allocation5 + $0xfe8] sm:$0xff]  }
 0x1ed   :  { %v5007_v52 = vadd.f32 %v6618_v47, %v7719_v7  ;;  %v6641_v53 = vpop.f32.mrf.mxu1  ;;  %6911 = vmatpush3.bf16.msra.mxu0 %v7512_v58  ;;  %v7524_v7 = vld [vmem:[#allocation5 + $0xe18] sm:$0xff]   ;;  %v7550_v47 = vld [vmem:[#allocation5 + $0xf68] sm:$0xff]   ;;  %v7554_v51 = vld [vmem:[#allocation5 + $0xf60] sm:$0xff]  }
 0x1ee   :  { %v6620_v56 = vpop.f32.mrf.mxu0  ;;  %6933 = vmatpush3.bf16.msra.mxu1 %v7513_v60  ;;  %6912 = vmatprep.subr.bf16.mxu0 %v7514_v61  ;;  %v7556_v53 = vld [vmem:[#allocation5 + $0xf20] sm:$0xff]   ;;  %v7561_v58 = vld [vmem:[#allocation5 + $0xf98] sm:$0xff]   ;;  %v7563_v60 = vld [vmem:[#allocation5 + $0xfd0] sm:$0xff]  }
 0x1ef   :  { %v7722_v57 = vadd.f32 %v6640_v50, %v5007_v52  ;;  %v6642_v59 = vpop.f32.mrf.mxu1  ;;  %6934 = vmatprep.subr.bf16.mxu1 %v7515_v62  ;;  %v7553_v50 = vld [vmem:[#allocation5 + $0xfa8] sm:$0xff]   ;;  %v7555_v52 = vld [vmem:[#allocation5 + $0xfe0] sm:$0xff]   ;;  %v7559_v56 = vld [vmem:[#allocation5 + $0xfd8] sm:$0xff]  }
 0x1f0   :  { %v7562_v59 = vld [vmem:[#allocation5 + $0xf50] sm:$0xff]  }
 0x1f1   :  { %6913 = vmatpush3.bf16.msra.mxu0 %v7516_v63  ;;  %v7564_v61 = vld [vmem:[#allocation5 + $0xf10] sm:$0xff]   ;;  %v7566_v63 = vld [vmem:[#allocation5 + $0xf48] sm:$0xff]  }
 0x1f2   :  { %6935 = vmatpush3.bf16.msra.mxu1 %v7517_v0  ;;  %6914 = vmatprep.subr.bf16.mxu0 %v7518_v1  ;;  %v7565_v62 = vld [vmem:[#allocation5 + $0xf90] sm:$0xff]   ;;  %v7567_v0 = vld [vmem:[#allocation5 + $0xfc8] sm:$0xff]  }
 0x1f3   :  { %6936 = vmatprep.subr.bf16.mxu1 %v7519_v2  ;;  %v7568_v1 = vld [vmem:[#allocation5 + $0xf08] sm:$0xff]  }
 0x1f4   :  { %v7569_v2 = vld [vmem:[#allocation5 + $0xf88] sm:$0xff]  }
 0x1f5   :  { %6915 = vmatpush3.bf16.msra.mxu0 %v7520_v3  ;;  %v7570_v3 = vld [vmem:[#allocation5 + $0xf40] sm:$0xff]  }
 0x1f6   :  { %6937 = vmatpush3.bf16.msra.mxu1 %v7521_v4  ;;  %6916 = vmatprep.subr.bf16.mxu0 %v7522_v5  ;;  %v7571_v4 = vld [vmem:[#allocation5 + $0xfc0] sm:$0xff]  }
 0x1f7   :  { %6938 = vmatprep.subr.bf16.mxu1 %v7523_v6  ;;  %v7572_v5 = vld [vmem:[#allocation5 + $0xf00] sm:$0xff]  }
 0x1f8   :  { %v7573_v6 = vld [vmem:[#allocation5 + $0xf80] sm:$0xff]  }
 0x1f9   :  { %6917 = vmatpush3.bf16.msra.mxu0 %v7524_v7  ;;  %v83_v7 = vld [vmem:[#allocation2 + $0xf0] sm:$0xff] }
 0x1fa   :  { %6939 = vmatpush3.bf16.msra.mxu1 %v7525_v8  ;;  %6918 = vmatprep.subr.bf16.mxu0 %v7526_v9  ;;  %v84_v8 = vld [vmem:[#allocation2 + $0xf8] sm:$0xff] }
 0x1fb   :  { %6940 = vmatprep.subr.bf16.mxu1 %v7527_v10  ;;  %v5776_v10 = vcombine.low %v83_v7, %v83_v7 }
 0x1fd   :  { %6919 = vmatpush3.bf16.msra.mxu0 %v7528_v11  ;;  %v5777_v11 = vcombine.high %v83_v7, %v83_v7 }
 0x1fe   :  { %6941 = vmatpush3.bf16.msra.mxu1 %v7529_v12  ;;  %6920 = vmatprep.subr.bf16.mxu0 %v7530_v13  ;;  %v5778_v12 = vcombine.low %v84_v8, %v84_v8  ;;  %v5779_v13 = vcombine.high %v84_v8, %v84_v8 }
 0x1ff   :  { %6942 = vmatprep.subr.bf16.mxu1 %v7531_v14 }
 0x201   :  { %6921 = vmatpush3.bf16.msra.mxu0 %v7532_v15 }
 0x202   :  { %6943 = vmatpush3.bf16.msra.mxu1 %v7533_v16  ;;  %6922 = vmatprep.subr.bf16.mxu0 %v7534_v17 }
 0x203   :  { %6944 = vmatprep.subr.bf16.mxu1 %v7535_v18 }
 0x205   :  { %6923 = vmatpush3.bf16.msra.mxu0 %v7536_v19 }
 0x206   :  { %6945 = vmatpush3.bf16.msra.mxu1 %v7537_v20  ;;  %6952 = vmatprep.subr.bf16.mxu0 %v7542_v29 }
 0x207   :  { %6974 = vmatprep.subr.bf16.mxu1 %v7543_v30 }
 0x208   :  { %v6660_v25 = vpop.f32.mrf.mxu0  ;;  %5565 = vmatmul.mubr.bf16.vlgmr.msra.gmra.mxu0 %v5772_v22 }
 0x209   :  { %v6682_v26 = vpop.f32.mrf.mxu1  ;;  %5605 = vmatmul.mubr.bf16.vlgmr.msra.gmra.mxu1 %v5774_v27  ;;  %6953 = vmatpush3.bf16.msra.mxu0 %v7544_v33 }
 0x20a   :  { %v6661_v31 = vpop.f32.mrf.mxu0  ;;  %6975 = vmatpush3.bf16.msra.mxu1 %v7545_v36  ;;  %6954 = vmatprep.subr.bf16.mxu0 %v7546_v40 }
 0x20b   :  { %v6683_v32 = vpop.f32.mrf.mxu1  ;;  %v6662_v34 = vadd.f32 %v6661_v31, %v6660_v25  ;;  %6976 = vmatprep.subr.bf16.mxu1 %v7547_v41  ;;  %5644 = vmatprep.mubr.bf16.mxu0 %v5777_v11 }
 0x20c   :  { %v6684_v35 = vadd.f32 %v6683_v32, %v6682_v26  ;;  %v6663_v37 = vpop.f32.mrf.mxu0  ;;  %5684 = vmatprep.mubr.bf16.mxu1 %v5779_v13 }
 0x20d   :  { %v6685_v38 = vpop.f32.mrf.mxu1  ;;  %v5087_v39 = vadd.f32 %v6662_v34, %v7722_v57  ;;  %6955 = vmatpush3.bf16.msra.mxu0 %v7548_v45  ;;  %v7560_v57 = vld [vmem:[#allocation5 + $0xf18] sm:$0xff]  }
 0x20e   :  { %v6664_v42 = vpop.f32.mrf.mxu0  ;;  %6977 = vmatpush3.bf16.msra.mxu1 %v7549_v46  ;;  %6956 = vmatprep.subr.bf16.mxu0 %v7550_v47 }
 0x20f   :  { %v6686_v43 = vpop.f32.mrf.mxu1  ;;  %v7725_v44 = vadd.f32 %v6684_v35, %v5087_v39  ;;  %6978 = vmatprep.subr.bf16.mxu1 %v7551_v48 }
 0x211   :  { %6957 = vmatpush3.bf16.msra.mxu0 %v7552_v49 }
 0x212   :  { %6979 = vmatpush3.bf16.msra.mxu1 %v7553_v50  ;;  %6958 = vmatprep.subr.bf16.mxu0 %v7554_v51 }
 0x213   :  { %6980 = vmatprep.subr.bf16.mxu1 %v7555_v52 }
 0x215   :  { %6959 = vmatpush3.bf16.msra.mxu0 %v7556_v53 }
 0x216   :  { %6981 = vmatpush3.bf16.msra.mxu1 %v7557_v54  ;;  %6960 = vmatprep.subr.bf16.mxu0 %v7558_v55 }
 0x217   :  { %6982 = vmatprep.subr.bf16.mxu1 %v7559_v56 }
 0x219   :  { %6961 = vmatpush3.bf16.msra.mxu0 %v7560_v57 }
 0x21a   :  { %6983 = vmatpush3.bf16.msra.mxu1 %v7561_v58  ;;  %6962 = vmatprep.subr.bf16.mxu0 %v7562_v59 }
 0x21b   :  { %6984 = vmatprep.subr.bf16.mxu1 %v7563_v60 }
 0x21d   :  { %6963 = vmatpush3.bf16.msra.mxu0 %v7564_v61 }
 0x21e   :  { %6985 = vmatpush3.bf16.msra.mxu1 %v7565_v62  ;;  %6964 = vmatprep.subr.bf16.mxu0 %v7566_v63 }
 0x21f   :  { %6986 = vmatprep.subr.bf16.mxu1 %v7567_v0 }
 0x221   :  { %6965 = vmatpush3.bf16.msra.mxu0 %v7568_v1 }
 0x222   :  { %6987 = vmatpush3.bf16.msra.mxu1 %v7569_v2  ;;  %6966 = vmatprep.subr.bf16.mxu0 %v7570_v3 }
 0x223   :  { %6988 = vmatprep.subr.bf16.mxu1 %v7571_v4 }
 0x225   :  { %6967 = vmatpush3.bf16.msra.mxu0 %v7572_v5 }
 0x226   :  { %6989 = vmatpush3.bf16.msra.mxu1 %v7573_v6 }
 0x228   :  { %v6704_v9 = vpop.f32.mrf.mxu0  ;;  %5645 = vmatmul.mubr.bf16.vlgmr.msra.gmra.mxu0 %v5776_v10 }
 0x229   :  { %v6726_v14 = vpop.f32.mrf.mxu1  ;;  %5685 = vmatmul.mubr.bf16.vlgmr.msra.gmra.mxu1 %v5778_v12 }
 0x22a   :  { %v6705_v15 = vpop.f32.mrf.mxu0 }
 0x22b   :  { %v6706_v16 = vadd.f32 %v6705_v15, %v6704_v9  ;;  %v6727_v17 = vpop.f32.mrf.mxu1 }
 0x22c   :  { %v6728_v18 = vadd.f32 %v6727_v17, %v6726_v14  ;;  %v6707_v19 = vpop.f32.mrf.mxu0 }
 0x22d   :  { %v5167_v20 = vadd.f32 %v6706_v16, %v7725_v44  ;;  %v6729_v21 = vpop.f32.mrf.mxu1 }
 0x22e   :  { %v6708_v22 = vpop.f32.mrf.mxu0 }
 0x22f   :  { %v5207_v23 = vadd.f32 %v6728_v18, %v5167_v20  ;;  %v6730_v24 = vpop.f32.mrf.mxu1 }
 0x248   :  { %v6748_v25 = vpop.f32.mrf.mxu0 }
 0x249   :  { %v6770_v26 = vpop.f32.mrf.mxu1 }
 0x24a   :  { %v6749_v27 = vpop.f32.mrf.mxu0 }
 0x24b   :  { %v6750_v28 = vadd.f32 %v6749_v27, %v6748_v25  ;;  %v6771_v29 = vpop.f32.mrf.mxu1 }
 0x24c   :  { %v6772_v30 = vadd.f32 %v6771_v29, %v6770_v26  ;;  %v6751_v31 = vpop.f32.mrf.mxu0 }
 0x24d   :  { %v5247_v32 = vadd.f32 %v6750_v28, %v5207_v23  ;;  %v6773_v33 = vpop.f32.mrf.mxu1 }
 0x24e   :  { %v6752_v34 = vpop.f32.mrf.mxu0 }
 0x24f   :  { %v5287_v35 = vadd.f32 %v6772_v30, %v5247_v32  ;;  %v6774_v36 = vpop.f32.mrf.mxu1 }
 0x268   :  { %v6792_v37 = vpop.f32.mrf.mxu0 }
 0x269   :  { %v6814_v38 = vpop.f32.mrf.mxu1 }
 0x26a   :  { %v6793_v39 = vpop.f32.mrf.mxu0 }
 0x26b   :  { %v6815_v40 = vpop.f32.mrf.mxu1  ;;  %v6794_v41 = vadd.f32 %v6793_v39, %v6792_v37 }
 0x26c   :  { %v6816_v42 = vadd.f32 %v6815_v40, %v6814_v38  ;;  %v6795_v43 = vpop.f32.mrf.mxu0 }
 0x26d   :  { %v6817_v44 = vpop.f32.mrf.mxu1  ;;  %v5327_v45 = vadd.f32 %v6794_v41, %v5287_v35 }
 0x26e   :  { %v6796_v46 = vpop.f32.mrf.mxu0 }
 0x26f   :  { %v6818_v47 = vpop.f32.mrf.mxu1  ;;  %v5367_v48 = vadd.f32 %v6816_v42, %v5327_v45 }
 0x288   :  { %v6836_v49 = vpop.f32.mrf.mxu0 }
 0x289   :  { %v6858_v50 = vpop.f32.mrf.mxu1 }
 0x28a   :  { %v6837_v51 = vpop.f32.mrf.mxu0 }
 0x28b   :  { %v6838_v52 = vadd.f32 %v6837_v51, %v6836_v49  ;;  %v6859_v53 = vpop.f32.mrf.mxu1 }
 0x28c   :  { %v6860_v54 = vadd.f32 %v6859_v53, %v6858_v50  ;;  %v6839_v55 = vpop.f32.mrf.mxu0 }
 0x28d   :  { %v5407_v56 = vadd.f32 %v6838_v52, %v5367_v48  ;;  %v6861_v57 = vpop.f32.mrf.mxu1 }
 0x28e   :  { %v6840_v58 = vpop.f32.mrf.mxu0 }
 0x28f   :  { %v5447_v59 = vadd.f32 %v6860_v54, %v5407_v56  ;;  %v6862_v60 = vpop.f32.mrf.mxu1 }
 0x2a8   :  { %v6880_v61 = vpop.f32.mrf.mxu0 }
 0x2a9   :  { %v6902_v62 = vpop.f32.mrf.mxu1 }
 0x2aa   :  { %v6881_v63 = vpop.f32.mrf.mxu0 }
 0x2ab   :  { %v6903_v0 = vpop.f32.mrf.mxu1  ;;  %v6882_v13 = vadd.f32 %v6881_v63, %v6880_v61 }
 0x2ac   :  { %v6883_v1 = vpop.f32.mrf.mxu0  ;;  %v6904_v15 = vadd.f32 %v6903_v0, %v6902_v62 }
 0x2ad   :  { %v6905_v2 = vpop.f32.mrf.mxu1  ;;  %v5487_v14 = vadd.f32 %v6882_v13, %v5447_v59 }
 0x2ae   :  { %v6884_v3 = vpop.f32.mrf.mxu0 }
 0x2af   :  { %v6906_v4 = vpop.f32.mrf.mxu1  ;;  %v5527_v17 = vadd.f32 %v6904_v15, %v5487_v14 }
 0x2c8   :  { %v6924_v5 = vpop.f32.mrf.mxu0 }
 0x2c9   :  { %v6946_v6 = vpop.f32.mrf.mxu1 }
 0x2ca   :  { %v6925_v7 = vpop.f32.mrf.mxu0 }
 0x2cb   :  { %v6947_v8 = vpop.f32.mrf.mxu1  ;;  %v6926_v16 = vadd.f32 %v6925_v7, %v6924_v5 }
 0x2cc   :  { %v6927_v9 = vpop.f32.mrf.mxu0  ;;  %v6948_v19 = vadd.f32 %v6947_v8, %v6946_v6 }
 0x2cd   :  { %v6949_v10 = vpop.f32.mrf.mxu1  ;;  %v5567_v18 = vadd.f32 %v6926_v16, %v5527_v17 }
 0x2ce   :  { %v6928_v11 = vpop.f32.mrf.mxu0 }
 0x2cf   :  { %v6950_v12 = vpop.f32.mrf.mxu1  ;;  %v5607_v23 = vadd.f32 %v6948_v19, %v5567_v18 }
 0x2e8   :  { %v6968_v20 = vpop.f32.mrf.mxu0 }
 0x2e9   :  { %v6990_v21 = vpop.f32.mrf.mxu1 }
 0x2ea   :  { %v6969_v22 = vpop.f32.mrf.mxu0 }
 0x2eb   :  { %v6970_v24 = vadd.f32 %v6969_v22, %v6968_v20  ;;  %v6991_v25 = vpop.f32.mrf.mxu1 }
 0x2ec   :  { %v6971_v26 = vpop.f32.mrf.mxu0  ;;  %v6992_v28 = vadd.f32 %v6991_v25, %v6990_v21 }
 0x2ed   :  { %v5647_v27 = vadd.f32 %v6970_v24, %v5607_v23  ;;  %v6993_v29 = vpop.f32.mrf.mxu1 }
 0x2ee   :  { %v6972_v30 = vpop.f32.mrf.mxu0 }
 0x2ef   :  { %v6994_v31 = vpop.f32.mrf.mxu1  ;;  %v5687_v32 = vadd.f32 %v6992_v28, %v5647_v27 }
 0x2f1   :  { %v5692_v33 = vmul.f32 %v5687_v32, %v5687_v32 }
 0x2f3   :  { %5693 = vadd.xlane.f32.xlu0 %v5692_v33 }
 0x37c   :  { %v5694_v34 = vpop.xlane.xlu0 %5693 }
 0x37d   :  { %v5695_v35 = vmax.f32 %v5694_v34, 1e-24 }
 0x37f   :  { %7578 = vrsqrt.f32 %v5695_v35 }
 0x38c   :  { %v7579_v36 = vpop.eup %7578 }
 0x38d   :  { %v5697_v37 = vmul.f32 %v7579_v36, %v5687_v32 }
 0x38f   :  { %5698 = vst [vmem:[#allocation8] sm:$0xff] %v5697_v37 }
 0x390   :  { %7651 = shalt.err (!%p7648_p5)
}
 0x391   :  { %5708 = dma.vmem_to_hbm [thread:$0]  %s5706_s2, 128, %s7734_s3, [#allocation4]  }
 0x392   :  { %7664 = dma.done.wait [#allocation4], 128  }
 0x393   :  { %7665 = vsyncadd [#allocation4], 4294967168 }
 0x394   :  { %5712 = vsyncpa [#allocation3], 1 }
 0x395   :  { %5713 = vsyncpa [#allocation6], 1 }
 0x396   :  { %5714 = vsyncpa [#allocation4], 1 }

</bundles_post_ra>
